<compile_context>
chip_gen: v7x
topology: tpu7x:2x2x1
jax: 0.10.0
libtpu: 0.0.40
codegen_flags: <defaults>
</compile_context>

<pallas_src>
import numpy as np
import jax
import jax.numpy as jnp
from jax import lax
from jax.experimental import pallas as pl
from jax.experimental.pallas import tpu as pltpu

B, C, H, W = 2, 64, 16, 16          # input is [B, 64, H, W] (ChannelAttention(64))
CR = C // 16                        # 4
COUT = 32
KS, PAD = 7, 3                      # SpatialAttention kernel
HO, WO = H // 2, W // 2             # F.interpolate(scale_factor=0.5)
HW, HWO = H * W, HO * WO
EPS = 1e-5

assert B == 2 and B * C == 128      # lane-packing assumes the 2-image batch fills 128 lanes


def bilinear_matrix(n_in, n_out):
    """Interpolation matrix for bilinear resize with align_corners=True."""
    M = np.zeros((n_out, n_in), np.float32)
    for o in range(n_out):
        src = o * (n_in - 1) / (n_out - 1) if n_out > 1 else 0.0
        i0 = int(np.floor(src))
        i1 = min(i0 + 1, n_in - 1)
        f = src - i0
        M[o, i0] += 1.0 - f
        M[o, i1] += f
    return M


def spatial_conv_matrices(sa_w):
    """Build [HW, HW] matrices K_mean, K_max so that
       s_col = K_mean @ mean_col + K_max @ max_col
    equals a 7x7 'same' cross-correlation (PyTorch Conv2d) over the 2-channel map."""
    w = np.asarray(sa_w, np.float32)[0]            # [2, KS, KS] (OIHW, single output ch)
    k_mean = np.zeros((HW, HW), np.float32)
    k_max = np.zeros((HW, HW), np.float32)
    for py in range(H):
        for px in range(W):
            p = py * W + px
            for dy in range(KS):
                for dx in range(KS):
                    qy, qx = py + dy - PAD, px + dx - PAD
                    if 0 <= qy < H and 0 <= qx < W:
                        q = qy * W + qx
                        k_mean[p, q] += w[0, dy, dx]   # in-ch 0: mean
                        k_max[p, q] += w[1, dy, dx]    # in-ch 1: max
    return jnp.asarray(k_mean), jnp.asarray(k_max)


def _sigmoid(v):
    # exp on EUP + approximate reciprocal on EUP: keeps the divide off the VPU.
    # (For x << 0, exp(-x) -> inf and 1/inf -> 0, which is still the correct limit.)
    return pl.reciprocal(1.0 + jnp.exp(-v), approx=True)


def _structure_attention_kernel(x_ref, w1_ref, w2_ref, mm_ref, kc_ref, sel_ref,
                                wc_ref, b_ref, d_ref, o_ref):
    xb = x_ref[...]                                            # [HW, B*C] f32 (lane-packed)

    # ---------------- channel attention (both images at once) ----------------
    avg = jnp.sum(xb, axis=0, keepdims=True) * (1.0 / HW)      # [1, B*C] sublane reduce
    mx = jnp.max(xb, axis=0, keepdims=True)                    # [1, B*C]
    pooled = jnp.concatenate([avg, mx], axis=0)                # [2, B*C]
    h = jnp.maximum(jnp.dot(pooled, w1_ref[...],
                            preferred_element_type=jnp.float32), 0.0)        # [2, B*CR]
    z = jnp.dot(h, w2_ref[...], preferred_element_type=jnp.float32)          # [2, B*C]
    ca = _sigmoid(z[0:1, :] + z[1:2, :])                       # [1, B*C]
    x1 = xb * ca                                               # [HW, B*C]

    # ---- 1x1 conv (BN folded) issued BEFORE the spatial gate (commutes with row scaling) ----
    y0 = jnp.dot(x1, wc_ref[...], preferred_element_type=jnp.float32)        # [HW, B*COUT]

    # ---------------- spatial attention: 7x7 'same' conv as ONE MXU matmul ----------------
    mean_cols = jnp.dot(x1, mm_ref[...], preferred_element_type=jnp.float32)  # [HW, B]
    lane = lax.broadcasted_iota(jnp.int32, (HW, B * C), 1)
    max0 = jnp.max(jnp.where(lane < C, x1, -jnp.inf), axis=1, keepdims=True)   # image 0
    max1 = jnp.max(jnp.where(lane >= C, x1, -jnp.inf), axis=1, keepdims=True)  # image 1
    max_cols = jnp.concatenate([max0, max1], axis=1)                           # [HW, B]
    rhs = jnp.concatenate([mean_cols, max_cols], axis=0)                       # [2*HW, B]
    s = jnp.dot(kc_ref[...], rhs, preferred_element_type=jnp.float32)          # [HW, B]
    # expand the per-image gate column to the per-image output-channel block
    gate = jnp.dot(_sigmoid(s), sel_ref[...],
                   preferred_element_type=jnp.float32)                         # [HW, B*COUT]

    # ---------------- gate, bias (after gate), ReLU, bilinear 0.5x ----------------
    y = jnp.maximum(gate * y0 + b_ref[...], 0.0)                               # [HW, B*COUT]
    o_ref[...] = jnp.dot(d_ref[...], y, preferred_element_type=jnp.float32)    # [HWO, B*COUT]


def structure_attention(x_nchw, params):
    w1_blk, w2_blk, m_mean, k_cat, sel, wc_blk, b_blk, dmat = params

    # NCHW -> lane-packed [HW, B*C]: row = h*W+w, lane = b*C + c
    x = jnp.transpose(x_nchw.astype(jnp.float32), (2, 3, 0, 1)).reshape(HW, B * C)

    out = pl.pallas_call(
        _structure_attention_kernel,
        out_shape=jax.ShapeDtypeStruct((HWO, B * COUT), jnp.float32),
        grid=(1,),
        in_specs=[
            pl.BlockSpec((HW, B * C), lambda i: (0, 0)),        # packed activations
            pl.BlockSpec((B * C, B * CR), lambda i: (0, 0)),    # kron(I_B, fc1 weight)
            pl.BlockSpec((B * CR, B * C), lambda i: (0, 0)),    # kron(I_B, fc2 weight)
            pl.BlockSpec((B * C, B), lambda i: (0, 0)),         # channel-mean selector
            pl.BlockSpec((HW, 2 * HW), lambda i: (0, 0)),       # K_cat = [K_mean | K_max]
            pl.BlockSpec((B, B * COUT), lambda i: (0, 0)),      # gate expansion selector
            pl.BlockSpec((B * C, B * COUT), lambda i: (0, 0)),  # kron(I_B, 1x1 conv weight)
            pl.BlockSpec((1, B * COUT), lambda i: (0, 0)),      # folded bias (tiled per image)
            pl.BlockSpec((HWO, HW), lambda i: (0, 0)),          # D = kron(Mh, Mw)
        ],
        out_specs=pl.BlockSpec((HWO, B * COUT), lambda i: (0, 0)),
        compiler_params=pltpu.CompilerParams(dimension_semantics=("arbitrary",)),
    )(x, w1_blk, w2_blk, m_mean, k_cat, sel, wc_blk, b_blk, dmat)

    # [HWO, B*COUT] -> NCHW [B, COUT, HO, WO]
    out = out.reshape(HO, WO, B, COUT)
    return jnp.transpose(out, (2, 3, 0, 1))


def make_params(key):
    ks = jax.random.split(key, 8)
    w1 = jax.random.normal(ks[0], (C, CR), jnp.float32) * 0.1           # fc1 (64 -> 4), no bias
    w2 = jax.random.normal(ks[1], (CR, C), jnp.float32) * 0.1           # fc2 (4 -> 64), no bias
    sa_w = jax.random.normal(ks[2], (1, 2, KS, KS), jnp.float32) * 0.1  # OIHW, ch0=mean, ch1=max
    wc = jax.random.normal(ks[3], (C, COUT), jnp.float32) * 0.05        # 1x1 conv (64 -> 32)
    bc = jax.random.normal(ks[4], (COUT,), jnp.float32) * 0.1           # conv bias (use_bias=True)
    gamma = jax.random.uniform(ks[5], (COUT,), jnp.float32, 0.5, 1.5)   # BN params (inference)
    beta = jax.random.normal(ks[6], (COUT,), jnp.float32) * 0.1
    rmean = jax.random.normal(ks[7], (COUT,), jnp.float32) * 0.1
    rvar = jnp.ones((COUT,), jnp.float32) * 0.8

    scale = gamma / jnp.sqrt(rvar + EPS)
    wc_eff = wc * scale[None, :]
    b_eff = ((bc - rmean) * scale + beta)[None, :]                      # [1, COUT]

    k_mean, k_max = spatial_conv_matrices(sa_w)
    k_cat = jnp.concatenate([k_mean, k_max], axis=1)                    # [HW, 2*HW]
    mh = jnp.asarray(bilinear_matrix(H, HO))
    mw = jnp.asarray(bilinear_matrix(W, WO))
    dmat = jnp.asarray(np.kron(bilinear_matrix(H, HO), bilinear_matrix(W, WO)))  # [HWO, HW]

    # lane-packed (block-diagonal) constants for the 2-image slab
    eye_b = jnp.eye(B, dtype=jnp.float32)
    w1_blk = jnp.kron(eye_b, w1)                                        # [B*C, B*CR]
    w2_blk = jnp.kron(eye_b, w2)                                        # [B*CR, B*C]
    wc_blk = jnp.kron(eye_b, wc_eff)                                    # [B*C, B*COUT]
    m_mean = jnp.kron(eye_b, jnp.full((C, 1), 1.0 / C, jnp.float32))    # [B*C, B]
    sel = jnp.kron(eye_b, jnp.ones((1, COUT), jnp.float32))             # [B, B*COUT]
    b_blk = jnp.tile(b_eff, (1, B))                                     # [1, B*COUT]

    kernel_params = (w1_blk, w2_blk, m_mean, k_cat, sel, wc_blk, b_blk, dmat)
    ref_params = (w1, w2, sa_w, wc_eff, b_eff, mh, mw)
    return kernel_params, ref_params


def reference(x_nchw, w1, w2, sa_w, wc_eff, b_eff, mh, mw):
    x = x_nchw.astype(jnp.float32)
    avg = jnp.mean(x, axis=(2, 3))
    mx = jnp.max(x, axis=(2, 3))

    def mlp(v):
        return jnp.maximum(v @ w1, 0.0) @ w2

    ca = jax.nn.sigmoid(mlp(avg) + mlp(mx))
    x = x * ca[:, :, None, None]

    mean_c = jnp.mean(x, axis=1, keepdims=True)
    max_c = jnp.max(x, axis=1, keepdims=True)
    s_in = jnp.concatenate([mean_c, max_c], axis=1)
    s = lax.conv_general_dilated(s_in, sa_w, (1, 1), ((PAD, PAD), (PAD, PAD)),
                                 dimension_numbers=('NCHW', 'OIHW', 'NCHW'))
    x = x * jax.nn.sigmoid(s)

    y = jnp.einsum('bchw,co->bohw', x, wc_eff) + b_eff.reshape(1, COUT, 1, 1)
    y = jnp.maximum(y, 0.0)
    out = jnp.einsum('oh,bchw,pw->bcop', mh, y, mw)
    return out


if __name__ == "__main__":
    key = jax.random.PRNGKey(0)
    kx_key, kp = jax.random.split(key)
    x = jax.random.normal(kx_key, (B, C, H, W), jnp.float32)

    kernel_params, ref_params = make_params(kp)

    out = structure_attention(x, kernel_params)
    out = jax.block_until_ready(out)
    assert out.shape == (B, COUT, HO, WO)

    ref = reference(x, *ref_params)
    # Tolerance 2e-3: the two sigmoids use the EUP approximate reciprocal
    # (pl.reciprocal(approx=True)), which differs from jax.nn.sigmoid by ~1e-4 relative.
    np.testing.assert_allclose(np.asarray(out), np.asarray(ref), atol=2e-3, rtol=2e-3)

    print("KERNEL_OK")
</pallas_src>

<mosaic_0001>
module attributes {stable_mosaic.version = 11 : i64} {
  func.func @_structure_attention_kernel(%arg0: i32, %arg1: memref<256x128xf32, #tpu.memory_space<vmem>>, %arg2: memref<128x8xf32, #tpu.memory_space<vmem>>, %arg3: memref<8x128xf32, #tpu.memory_space<vmem>>, %arg4: memref<128x2xf32, #tpu.memory_space<vmem>>, %arg5: memref<256x512xf32, #tpu.memory_space<vmem>>, %arg6: memref<2x64xf32, #tpu.memory_space<vmem>>, %arg7: memref<128x64xf32, #tpu.memory_space<vmem>>, %arg8: memref<1x64xf32, #tpu.memory_space<vmem>>, %arg9: memref<64x256xf32, #tpu.memory_space<vmem>>, %arg10: memref<64x64xf32, #tpu.memory_space<vmem>>) attributes {dimension_semantics = [#tpu.dimension_semantics<arbitrary>], iteration_bounds = array<i64: 1>, scalar_prefetch = 0 : i64, scratch_operands = 0 : i64, tpu.core_type = #tpu.core_type<tc>, window_params = [{pipeline_mode = #tpu.pipeline_mode<synchronous>, transform_indices = @transform_0, window_bounds = array<i64: 256, 128>}, {pipeline_mode = #tpu.pipeline_mode<synchronous>, transform_indices = @transform_1, window_bounds = array<i64: 128, 8>}, {pipeline_mode = #tpu.pipeline_mode<synchronous>, transform_indices = @transform_2, window_bounds = array<i64: 8, 128>}, {pipeline_mode = #tpu.pipeline_mode<synchronous>, transform_indices = @transform_3, window_bounds = array<i64: 128, 2>}, {pipeline_mode = #tpu.pipeline_mode<synchronous>, transform_indices = @transform_4, window_bounds = array<i64: 256, 512>}, {pipeline_mode = #tpu.pipeline_mode<synchronous>, transform_indices = @transform_5, window_bounds = array<i64: 2, 64>}, {pipeline_mode = #tpu.pipeline_mode<synchronous>, transform_indices = @transform_6, window_bounds = array<i64: 128, 64>}, {pipeline_mode = #tpu.pipeline_mode<synchronous>, transform_indices = @transform_7, window_bounds = array<i64: 1, 64>}, {pipeline_mode = #tpu.pipeline_mode<synchronous>, transform_indices = @transform_8, window_bounds = array<i64: 64, 256>}, {pipeline_mode = #tpu.pipeline_mode<synchronous>, transform_indices = @transform_9, window_bounds = array<i64: 64, 64>}]} {
    %c0 = arith.constant 0 : index
    %c0_0 = arith.constant 0 : index
    %0 = vector.load %arg1[%c0, %c0_0] : memref<256x128xf32, #tpu.memory_space<vmem>>, vector<256x128xf32>
    %cst = arith.constant dense<0.000000e+00> : vector<128xf32>
    %1 = vector.multi_reduction <add>, %0, %cst [0] : vector<256x128xf32> to vector<128xf32>
    %2 = vector.shape_cast %1 : vector<128xf32> to vector<1x128xf32>
    %cst_1 = arith.constant 3.906250e-03 : f32
    %3 = vector.broadcast %cst_1 : f32 to vector<1x128xf32>
    %4 = arith.mulf %2, %3 : vector<1x128xf32>
    %cst_2 = arith.constant dense<0xFF800000> : vector<128xf32>
    %5 = vector.multi_reduction <maximumf>, %0, %cst_2 [0] : vector<256x128xf32> to vector<128xf32>
    %6 = vector.shape_cast %5 : vector<128xf32> to vector<1x128xf32>
    %7 = tpu.concatenate %4, %6 in 0 : vector<1x128xf32>, vector<1x128xf32> -> vector<2x128xf32>
    %c0_3 = arith.constant 0 : index
    %c0_4 = arith.constant 0 : index
    %8 = vector.load %arg2[%c0_3, %c0_4] : memref<128x8xf32, #tpu.memory_space<vmem>>, vector<128x8xf32>
    %cst_5 = arith.constant dense<0.000000e+00> : vector<2x8xf32>
    %9 = tpu.matmul %7, %8, %cst_5 {dimension_numbers = #tpu.dot_dimension_numbers<[1], [0], [0], [1], [0, 0, 1, 1], [], []>} : vector<2x128xf32>, vector<128x8xf32>, vector<2x8xf32> -> vector<2x8xf32>
    %cst_6 = arith.constant 0.000000e+00 : f32
    %10 = vector.broadcast %cst_6 : f32 to vector<2x8xf32>
    %11 = arith.maximumf %9, %10 : vector<2x8xf32>
    %c0_7 = arith.constant 0 : index
    %c0_8 = arith.constant 0 : index
    %12 = vector.load %arg3[%c0_7, %c0_8] : memref<8x128xf32, #tpu.memory_space<vmem>>, vector<8x128xf32>
    %cst_9 = arith.constant dense<0.000000e+00> : vector<2x128xf32>
    %13 = tpu.matmul %11, %12, %cst_9 {dimension_numbers = #tpu.dot_dimension_numbers<[1], [0], [0], [1], [0, 0, 1, 1], [], []>} : vector<2x8xf32>, vector<8x128xf32>, vector<2x128xf32> -> vector<2x128xf32>
    %14 = vector.extract_strided_slice %13 {offsets = [0, 0], sizes = [1, 128], strides = [1, 1]} : vector<2x128xf32> to vector<1x128xf32>
    %15 = vector.extract_strided_slice %13 {offsets = [1, 0], sizes = [1, 128], strides = [1, 1]} : vector<2x128xf32> to vector<1x128xf32>
    %16 = arith.addf %14, %15 : vector<1x128xf32>
    %cst_10 = arith.constant 0.000000e+00 : f32
    %17 = vector.broadcast %cst_10 : f32 to vector<1x128xf32>
    %18 = arith.subf %17, %16 : vector<1x128xf32>
    %19 = math.exp %18 : vector<1x128xf32>
    %cst_11 = arith.constant 1.000000e+00 : f32
    %20 = vector.broadcast %cst_11 : f32 to vector<1x128xf32>
    %21 = arith.addf %20, %19 : vector<1x128xf32>
    %22 = tpu.reciprocal %21 {approx = true} : vector<1x128xf32> -> vector<1x128xf32>
    %23 = vector.broadcast %22 : vector<1x128xf32> to vector<256x128xf32>
    %24 = arith.mulf %0, %23 : vector<256x128xf32>
    %c0_12 = arith.constant 0 : index
    %c0_13 = arith.constant 0 : index
    %25 = vector.load %arg7[%c0_12, %c0_13] : memref<128x64xf32, #tpu.memory_space<vmem>>, vector<128x64xf32>
    %cst_14 = arith.constant dense<0.000000e+00> : vector<256x64xf32>
    %26 = tpu.matmul %24, %25, %cst_14 {dimension_numbers = #tpu.dot_dimension_numbers<[1], [0], [0], [1], [0, 0, 1, 1], [], []>} : vector<256x128xf32>, vector<128x64xf32>, vector<256x64xf32> -> vector<256x64xf32>
    %c0_15 = arith.constant 0 : index
    %c0_16 = arith.constant 0 : index
    %27 = vector.load %arg4[%c0_15, %c0_16] : memref<128x2xf32, #tpu.memory_space<vmem>>, vector<128x2xf32>
    %cst_17 = arith.constant dense<0.000000e+00> : vector<256x2xf32>
    %28 = tpu.matmul %24, %27, %cst_17 {dimension_numbers = #tpu.dot_dimension_numbers<[1], [0], [0], [1], [0, 0, 1, 1], [], []>} : vector<256x128xf32>, vector<128x2xf32>, vector<256x2xf32> -> vector<256x2xf32>
    %29 = tpu.iota {dimensions = array<i32: 1>} : vector<256x128xi32>
    %c64_i32 = arith.constant 64 : i32
    %30 = vector.broadcast %c64_i32 : i32 to vector<256x128xi32>
    %31 = arith.cmpi slt, %29, %30 : vector<256x128xi32>
    %cst_18 = arith.constant 0xFF800000 : f32
    %32 = vector.broadcast %cst_18 : f32 to vector<256x128xf32>
    %33 = arith.select %31, %24, %32 : vector<256x128xi1>, vector<256x128xf32>
    %cst_19 = arith.constant dense<0xFF800000> : vector<256xf32>
    %34 = vector.multi_reduction <maximumf>, %33, %cst_19 [1] : vector<256x128xf32> to vector<256xf32>
    %35 = vector.shape_cast %34 : vector<256xf32> to vector<256x1xf32>
    %c64_i32_20 = arith.constant 64 : i32
    %36 = vector.broadcast %c64_i32_20 : i32 to vector<256x128xi32>
    %37 = arith.cmpi sge, %29, %36 : vector<256x128xi32>
    %cst_21 = arith.constant 0xFF800000 : f32
    %38 = vector.broadcast %cst_21 : f32 to vector<256x128xf32>
    %39 = arith.select %37, %24, %38 : vector<256x128xi1>, vector<256x128xf32>
    %cst_22 = arith.constant dense<0xFF800000> : vector<256xf32>
    %40 = vector.multi_reduction <maximumf>, %39, %cst_22 [1] : vector<256x128xf32> to vector<256xf32>
    %41 = vector.shape_cast %40 : vector<256xf32> to vector<256x1xf32>
    %42 = tpu.concatenate %35, %41 in 1 : vector<256x1xf32>, vector<256x1xf32> -> vector<256x2xf32>
    %43 = tpu.concatenate %28, %42 in 0 : vector<256x2xf32>, vector<256x2xf32> -> vector<512x2xf32>
    %c0_23 = arith.constant 0 : index
    %c0_24 = arith.constant 0 : index
    %44 = vector.load %arg5[%c0_23, %c0_24] : memref<256x512xf32, #tpu.memory_space<vmem>>, vector<256x512xf32>
    %cst_25 = arith.constant dense<0.000000e+00> : vector<256x2xf32>
    %45 = tpu.matmul %44, %43, %cst_25 {dimension_numbers = #tpu.dot_dimension_numbers<[1], [0], [0], [1], [0, 0, 1, 1], [], []>} : vector<256x512xf32>, vector<512x2xf32>, vector<256x2xf32> -> vector<256x2xf32>
    %cst_26 = arith.constant 0.000000e+00 : f32
    %46 = vector.broadcast %cst_26 : f32 to vector<256x2xf32>
    %47 = arith.subf %46, %45 : vector<256x2xf32>
    %48 = math.exp %47 : vector<256x2xf32>
    %cst_27 = arith.constant 1.000000e+00 : f32
    %49 = vector.broadcast %cst_27 : f32 to vector<256x2xf32>
    %50 = arith.addf %49, %48 : vector<256x2xf32>
    %51 = tpu.reciprocal %50 {approx = true} : vector<256x2xf32> -> vector<256x2xf32>
    %c0_28 = arith.constant 0 : index
    %c0_29 = arith.constant 0 : index
    %52 = vector.load %arg6[%c0_28, %c0_29] : memref<2x64xf32, #tpu.memory_space<vmem>>, vector<2x64xf32>
    %cst_30 = arith.constant dense<0.000000e+00> : vector<256x64xf32>
    %53 = tpu.matmul %51, %52, %cst_30 {dimension_numbers = #tpu.dot_dimension_numbers<[1], [0], [0], [1], [0, 0, 1, 1], [], []>} : vector<256x2xf32>, vector<2x64xf32>, vector<256x64xf32> -> vector<256x64xf32>
    %54 = arith.mulf %53, %26 : vector<256x64xf32>
    %c0_31 = arith.constant 0 : index
    %c0_32 = arith.constant 0 : index
    %55 = vector.load %arg8[%c0_31, %c0_32] : memref<1x64xf32, #tpu.memory_space<vmem>>, vector<1x64xf32>
    %56 = vector.broadcast %55 : vector<1x64xf32> to vector<256x64xf32>
    %57 = arith.addf %54, %56 : vector<256x64xf32>
    %cst_33 = arith.constant 0.000000e+00 : f32
    %58 = vector.broadcast %cst_33 : f32 to vector<256x64xf32>
    %59 = arith.maximumf %57, %58 : vector<256x64xf32>
    %c0_34 = arith.constant 0 : index
    %c0_35 = arith.constant 0 : index
    %60 = vector.load %arg9[%c0_34, %c0_35] : memref<64x256xf32, #tpu.memory_space<vmem>>, vector<64x256xf32>
    %cst_36 = arith.constant dense<0.000000e+00> : vector<64x64xf32>
    %61 = tpu.matmul %60, %59, %cst_36 {dimension_numbers = #tpu.dot_dimension_numbers<[1], [0], [0], [1], [0, 0, 1, 1], [], []>} : vector<64x256xf32>, vector<256x64xf32>, vector<64x64xf32> -> vector<64x64xf32>
    %c0_37 = arith.constant 0 : index
    %c0_38 = arith.constant 0 : index
    %62 = vector.load %arg10[%c0_37, %c0_38] : memref<64x64xf32, #tpu.memory_space<vmem>>, vector<64x64xf32>
    tpu.vector_store %arg10[%c0_37, %c0_38], %61 {strides = array<i32>} : memref<64x64xf32, #tpu.memory_space<vmem>>, vector<64x64xf32>,
    return
  }
  func.func @transform_0(%arg0: i32) -> (i32, i32) {
    %c0_i32 = arith.constant 0 : i32
    %c0_i32_0 = arith.constant 0 : i32
    %c0_i32_1 = arith.constant 0 : i32
    return %c0_i32, %c0_i32_0 : i32, i32
  }
  func.func @transform_1(%arg0: i32) -> (i32, i32) {
    %c0_i32 = arith.constant 0 : i32
    %c0_i32_0 = arith.constant 0 : i32
    %c0_i32_1 = arith.constant 0 : i32
    return %c0_i32, %c0_i32_0 : i32, i32
  }
  func.func @transform_2(%arg0: i32) -> (i32, i32) {
    %c0_i32 = arith.constant 0 : i32
    %c0_i32_0 = arith.constant 0 : i32
    %c0_i32_1 = arith.constant 0 : i32
    return %c0_i32, %c0_i32_0 : i32, i32
  }
  func.func @transform_3(%arg0: i32) -> (i32, i32) {
    %c0_i32 = arith.constant 0 : i32
    %c0_i32_0 = arith.constant 0 : i32
    %c0_i32_1 = arith.constant 0 : i32
    return %c0_i32, %c0_i32_0 : i32, i32
  }
  func.func @transform_4(%arg0: i32) -> (i32, i32) {
    %c0_i32 = arith.constant 0 : i32
    %c0_i32_0 = arith.constant 0 : i32
    %c0_i32_1 = arith.constant 0 : i32
    return %c0_i32, %c0_i32_0 : i32, i32
  }
  func.func @transform_5(%arg0: i32) -> (i32, i32) {
    %c0_i32 = arith.constant 0 : i32
    %c0_i32_0 = arith.constant 0 : i32
    %c0_i32_1 = arith.constant 0 : i32
    return %c0_i32, %c0_i32_0 : i32, i32
  }
  func.func @transform_6(%arg0: i32) -> (i32, i32) {
    %c0_i32 = arith.constant 0 : i32
    %c0_i32_0 = arith.constant 0 : i32
    %c0_i32_1 = arith.constant 0 : i32
    return %c0_i32, %c0_i32_0 : i32, i32
  }
  func.func @transform_7(%arg0: i32) -> (i32, i32) {
    %c0_i32 = arith.constant 0 : i32
    %c0_i32_0 = arith.constant 0 : i32
    %c0_i32_1 = arith.constant 0 : i32
    return %c0_i32, %c0_i32_0 : i32, i32
  }
  func.func @transform_8(%arg0: i32) -> (i32, i32) {
    %c0_i32 = arith.constant 0 : i32
    %c0_i32_0 = arith.constant 0 : i32
    %c0_i32_1 = arith.constant 0 : i32
    return %c0_i32, %c0_i32_0 : i32, i32
  }
  func.func @transform_9(%arg0: i32) -> (i32, i32) {
    %c0_i32 = arith.constant 0 : i32
    %c0_i32_0 = arith.constant 0 : i32
    %c0_i32_1 = arith.constant 0 : i32
    return %c0_i32, %c0_i32_0 : i32, i32
  }
}

</mosaic_0001>

<bundles_post_ra>
// kernel: tpu_custom_call.1
= control target key start
LH: loop header
LB: loop body
LE: loop exit
PB: predicated region body
PF: predicated region fallthrough
CT: control target
= control target key end

     0   :  { %14 = vsyncpa [#allocation3], 0  ;;  %s4792_s0 = inlined_call_operand.vmem [shape: f32[256,128], index: 0, kind: input, shape index: {}]   ;;  %s4793_s1 = inlined_call_operand.vmem [shape: f32[128,8], index: 1, kind: input, shape index: {}]   ;;  %s4794_s2 = inlined_call_operand.vmem [shape: f32[8,128], index: 2, kind: input, shape index: {}]   ;;  %s4795_s3 = inlined_call_operand.vmem [shape: f32[128,2], index: 3, kind: input, shape index: {}]   ;;  %s4796_s4 = inlined_call_operand.hbm [shape: f32[256,512], index: 4, kind: input, shape index: {}]   ;;  %s4797_s5 = inlined_call_operand.vmem [shape: f32[2,64], index: 5, kind: input, shape index: {}]   ;;  %s4798_s6 = inlined_call_operand.vmem [shape: f32[128,64], index: 6, kind: input, shape index: {}]   ;;  %s4799_s7 = inlined_call_operand.vmem [shape: f32[1,64], index: 7, kind: input, shape index: {}]   ;;  %s4800_s8 = inlined_call_operand.vmem [shape: f32[64,256], index: 8, kind: input, shape index: {}]   ;;  %s4801_s9 = inlined_call_operand.hbm [shape: f32[64,64], index: 9, kind: output, shape index: {}]  }
   0x1   :  { %15 = vsyncpa [#allocation4], 0  ;;  %s3363_s30 = smov [#allocation2]   ;;  %s3315_s13 = scalar_lea.hbm %s4796_s4, 16384 }
   0x2   :  { %s29_s10 = sshll.u32 %s3363_s30, 4  ;;  %p3316_p0 = scmp.ne.s32.totalorder %s4796_s4, %s3315_s13  ;;  %s30_s10 = int_to_ptr.vmem [resolvable:$true] %s29_s10 }
   0x3   :  { %p3319_p1 = scmp.lt.u32.totalorder %s3315_s13, %s4796_s4 }
   0x5   :  { %p3321_p2 = pnand %p3319_p1, %p3316_p0 }
   0x7   :  { %3324 = shalt.err (!%p3321_p2)
}
   0x8   :  { %s3325_s18 = scalar_lea.vmem %s30_s10, 16384  ;;  %p3330_p4 = scmp.lt.s32.totalorder %s30_s10, %s30_s10 }
   0x9   :  { %p3326_p3 = scmp.ne.s32.totalorder %s30_s10, %s3325_s18  ;;  %p3331_p5 = scmp.lt.s32.totalorder %s3325_s18, %s3325_s18 }
   0xb   :  { %p3332_p6 = por %p3331_p5, %p3330_p4 }
   0xd   :  { %p3333_p7 = pnand %p3332_p6, %p3326_p3 }
   0xf   :  { %3336 = shalt.err (!%p3333_p7)
}
  0x10   :  { %s3364_s19 = smov 512   ;;  %s3365_s20 = smov 32  }
  0x11   :  { %35 = dma.hbm_to_vmem [thread:$0]  %s4796_s4, 16384, %s30_s10, [#allocation3], %s3364_s19, %s3364_s19, %s3365_s20  }
  0x12   :  { %3359 = dma.done.wait [#allocation3], 16384  }
  0x13   :  { %3360 = vsyncadd [#allocation3], 4294950912  ;;  %v4802_v0 = vmov 0.0|0.0   ;;  %vm3367_vm0 = vmmov 0   ;;  %v3368_v1 = vmov 0.0   ;;  %v156_v2 = vld [vmem:[%s4793_s1] sm:$0xff] }
  0x14   :  { %2878 = vmatprep.subr.bf16.mxu0 %v4802_v0  ;;  %2660 = vmatprep.mubr.msk.f32.mxu0 %vm3367_vm0, %v3368_v1  ;;  %v157_v3 = vld [vmem:[%s4793_s1 + $0x8] sm:$0xff]  ;;  %v158_v4 = vld [vmem:[%s4793_s1 + $0x10] sm:$0xff]  ;;  %v159_v6 = vld [vmem:[%s4793_s1 + $0x18] sm:$0xff]  ;;  %vm154_vm1 = vcmask 1040384   ;;  %vm244_vm2 = vcmask 64512   ;;  %vm1041_vm5 = vcmask 7168  }
  0x15   :  { %2663 = vmatprep.subr.mxu1 %v3368_v1  ;;  %2665 = vmatprep.mubr.msk.f32.mxu1 %vm3367_vm0, %v3368_v1  ;;  %v2879_v5 = vpack.c.bf16 %v157_v3, %v156_v2  ;;  %v2882_v7 = vpack.c.bf16 %v159_v6, %v158_v4  ;;  %v160_v8 = vld [vmem:[%s4793_s1 + $0x20] sm:$0xff]  ;;  %v161_v9 = vld [vmem:[%s4793_s1 + $0x28] sm:$0xff]  ;;  %v3467_v12 = vld [vmem:[%s4792_s0 + $0x10] sm:$0xff]  ;;  %vm1910_vm6 = vcmask 1041408   ;;  %vm1813_vm7 = vcmask 15360  }
  0x16   :  { %v3457_v10 = vld [vmem:[%s4792_s0] sm:$0xff]  ;;  %v3462_v11 = vld [vmem:[%s4792_s0 + $0x8] sm:$0xff]  ;;  %v2885_v14 = vpack.c.bf16 %v161_v9, %v160_v8  ;;  %v3474_v15 = vld [vmem:[%s4792_s0 + $0x18] sm:$0xff]  ;;  %vm2363_vm8 = vcmask 523264  }
  0x17   :  { %2880 = vmatpush3.bf16.msra.mxu0 %v2879_v5  ;;  %v79_v13 = vadd.f32 %v3462_v11, %v3457_v10  ;;  %v162_v16 = vld [vmem:[%s4793_s1 + $0x30] sm:$0xff]  ;;  %v163_v17 = vld [vmem:[%s4793_s1 + $0x38] sm:$0xff]  ;;  %v3487_v19 = vld [vmem:[%s4792_s0 + $0x20] sm:$0xff] }
  0x18   :  { %2881 = vmatprep.subr.bf16.mxu0 %v4802_v0  ;;  %v2888_v21 = vpack.c.bf16 %v163_v17, %v162_v16  ;;  %v3493_v22 = vld [vmem:[%s4792_s0 + $0x28] sm:$0xff]  ;;  %v164_v23 = vld [vmem:[%s4793_s1 + $0x40] sm:$0xff]  ;;  %v3506_v26 = vld [vmem:[%s4792_s0 + $0x30] sm:$0xff]  ;;  %v117_v41 = vmax.f32 %v3457_v10, %v3487_v19 }
  0x19   :  { %v80_v18 = vadd.f32 %v79_v13, %v3467_v12  ;;  %v165_v24 = vld [vmem:[%s4793_s1 + $0x48] sm:$0xff]  ;;  %v3512_v29 = vld [vmem:[%s4792_s0 + $0x38] sm:$0xff]  ;;  %v166_v30 = vld [vmem:[%s4793_s1 + $0x50] sm:$0xff]  ;;  %v118_v43 = vmax.f32 %v3462_v11, %v3493_v22  ;;  %v119_v44 = vmax.f32 %v3467_v12, %v3506_v26 }
  0x1a   :  { %v2891_v28 = vpack.c.bf16 %v165_v24, %v164_v23  ;;  %v167_v31 = vld [vmem:[%s4793_s1 + $0x58] sm:$0xff]  ;;  %v3525_v33 = vld [vmem:[%s4792_s0 + $0x40] sm:$0xff]  ;;  %v3531_v36 = vld [vmem:[%s4792_s0 + $0x48] sm:$0xff]  ;;  %v120_v45 = vmax.f32 %v3474_v15, %v3512_v29 }
  0x1b   :  { %2883 = vmatpush3.bf16.msra.mxu0 %v2882_v7  ;;  %v81_v20 = vadd.f32 %v80_v18, %v3474_v15  ;;  %v2894_v35 = vpack.c.bf16 %v167_v31, %v166_v30  ;;  %v168_v37 = vld [vmem:[%s4793_s1 + $0x60] sm:$0xff]  ;;  %v169_v38 = vld [vmem:[%s4793_s1 + $0x68] sm:$0xff]  ;;  %v3544_v40 = vld [vmem:[%s4792_s0 + $0x50] sm:$0xff]  ;;  %v121_v52 = vmax.f32 %v117_v41, %v3525_v33  ;;  %v122_v54 = vmax.f32 %v118_v43, %v3531_v36 }
  0x1c   :  { %2884 = vmatprep.subr.bf16.mxu0 %v4802_v0  ;;  %v2897_v46 = vpack.c.bf16 %v169_v38, %v168_v37  ;;  %v3558_v47 = vld [vmem:[%s4792_s0 + $0x58] sm:$0xff]  ;;  %v170_v48 = vld [vmem:[%s4793_s1 + $0x70] sm:$0xff]  ;;  %v3571_v51 = vld [vmem:[%s4792_s0 + $0x60] sm:$0xff]  ;;  %v123_v55 = vmax.f32 %v119_v44, %v3544_v40 }
  0x1d   :  { %v82_v25 = vadd.f32 %v81_v20, %v3487_v19  ;;  %v171_v49 = vld [vmem:[%s4793_s1 + $0x78] sm:$0xff]  ;;  %v124_v56 = vmax.f32 %v120_v45, %v3558_v47  ;;  %v3581_v58 = vld [vmem:[%s4792_s0 + $0x68] sm:$0xff]  ;;  %v3588_v60 = vld [vmem:[%s4792_s0 + $0x70] sm:$0xff]  ;;  %v125_v62 = vmax.f32 %v121_v52, %v3571_v51 }
  0x1e   :  { %v2900_v57 = vpack.c.bf16 %v171_v49, %v170_v48  ;;  %v3593_v61 = vld [vmem:[%s4792_s0 + $0x78] sm:$0xff]  ;;  %v126_v1 = vmax.f32 %v122_v54, %v3581_v58  ;;  %v127_v2 = vmax.f32 %v123_v55, %v3588_v60  ;;  %v3603_v4 = vld [vmem:[%s4792_s0 + $0x80] sm:$0xff]  ;;  %v3609_v6 = vld [vmem:[%s4792_s0 + $0x88] sm:$0xff] }
  0x1f   :  { %2886 = vmatpush3.bf16.msra.mxu0 %v2885_v14  ;;  %v83_v27 = vadd.f32 %v82_v25, %v3493_v22  ;;  %v128_v3 = vmax.f32 %v124_v56, %v3593_v61  ;;  %v3614_v7 = vld [vmem:[%s4792_s0 + $0x90] sm:$0xff]  ;;  %v3619_v8 = vld [vmem:[%s4792_s0 + $0x98] sm:$0xff]  ;;  %v129_v9 = vmax.f32 %v125_v62, %v3603_v4  ;;  %v3629_v18 = vld [vmem:[%s4792_s0 + $0xa0] sm:$0xff] }
  0x20   :  { %2887 = vmatprep.subr.bf16.mxu0 %v4802_v0  ;;  %v130_v14 = vmax.f32 %v126_v1, %v3609_v6  ;;  %v131_v16 = vmax.f32 %v127_v2, %v3614_v7  ;;  %v3640_v23 = vld [vmem:[%s4792_s0 + $0xb0] sm:$0xff]  ;;  %v3645_v24 = vld [vmem:[%s4792_s0 + $0xb8] sm:$0xff]  ;;  %v3691_v48 = vld [vmem:[%s4792_s0 + $0xe0] sm:$0xff] }
  0x21   :  { %v84_v32 = vadd.f32 %v83_v27, %v3506_v26  ;;  %v132_v17 = vmax.f32 %v128_v3, %v3619_v8  ;;  %v133_v25 = vmax.f32 %v129_v9, %v3629_v18  ;;  %v3666_v37 = vld [vmem:[%s4792_s0 + $0xd0] sm:$0xff]  ;;  %v3671_v38 = vld [vmem:[%s4792_s0 + $0xd8] sm:$0xff] }
  0x22   :  { %v135_v30 = vmax.f32 %v131_v16, %v3640_v23  ;;  %v3681_v45 = vld [vmem:[%s4792_s0 + $0xf0] sm:$0xff] }
  0x23   :  { %2889 = vmatpush3.bf16.msra.mxu0 %v2888_v21  ;;  %v85_v34 = vadd.f32 %v84_v32, %v3512_v29  ;;  %v3635_v21 = vld [vmem:[%s4792_s0 + $0xa8] sm:$0xff]  ;;  %v136_v31 = vmax.f32 %v132_v17, %v3645_v24  ;;  %v3655_v32 = vld [vmem:[%s4792_s0 + $0xc0] sm:$0xff] }
  0x24   :  { %2890 = vmatprep.subr.bf16.mxu0 %v4802_v0  ;;  %v139_v43 = vmax.f32 %v135_v30, %v3666_v37 }
  0x25   :  { %v86_v39 = vadd.f32 %v85_v34, %v3525_v33  ;;  %v140_v44 = vmax.f32 %v136_v31, %v3671_v38 }
  0x26   :  { %v143_v55 = vmax.f32 %v139_v43, %v3681_v45 }
  0x27   :  { %2892 = vmatpush3.bf16.msra.mxu0 %v2891_v28  ;;  %v87_v42 = vadd.f32 %v86_v39, %v3531_v36  ;;  %v134_v28 = vmax.f32 %v130_v14, %v3635_v21  ;;  %v137_v39 = vmax.f32 %v133_v25, %v3655_v32 }
  0x28   :  { %2893 = vmatprep.subr.bf16.mxu0 %v4802_v0 }
  0x29   :  { %v88_v50 = vadd.f32 %v87_v42, %v3544_v40  ;;  %v141_v52 = vmax.f32 %v137_v39, %v3691_v48 }
  0x2b   :  { %2895 = vmatpush3.bf16.msra.mxu0 %v2894_v35  ;;  %v89_v53 = vadd.f32 %v88_v50, %v3558_v47  ;;  %v3661_v35 = vld [vmem:[%s4792_s0 + $0xc8] sm:$0xff] }
  0x2c   :  { %2896 = vmatprep.subr.bf16.mxu0 %v4802_v0  ;;  %v138_v42 = vmax.f32 %v134_v28, %v3661_v35  ;;  %v3697_v50 = vld [vmem:[%s4792_s0 + $0xe8] sm:$0xff] }
  0x2d   :  { %v90_v59 = vadd.f32 %v89_v53, %v3571_v51 }
  0x2e   :  { %v142_v54 = vmax.f32 %v138_v42, %v3697_v50 }
  0x2f   :  { %2898 = vmatpush3.bf16.msra.mxu0 %v2897_v46  ;;  %v91_v63 = vadd.f32 %v90_v59, %v3581_v58  ;;  %v3686_v46 = vld [vmem:[%s4792_s0 + $0xf8] sm:$0xff] }
  0x30   :  { %2899 = vmatprep.subr.bf16.mxu0 %v4802_v0  ;;  %v144_v56 = vmax.f32 %v140_v44, %v3686_v46  ;;  %v145_v62 = vmax.f32 %v141_v52, %v142_v54 }
  0x31   :  { %v92_v5 = vadd.f32 %v91_v63, %v3588_v60 }
  0x32   :  { %v146_v63 = vmax.f32 %v143_v55, %v144_v56 }
  0x33   :  { %2901 = vmatpush3.bf16.msra.mxu0 %v2900_v57  ;;  %v93_v13 = vadd.f32 %v92_v5, %v3593_v61 }
  0x34   :  { %v147_v3 = vmax.f32 %v145_v62, %v146_v63  ;;  %v604_v62 = vld [vmem:[%s4795_s3] sm:$0xff] }
  0x35   :  { %v94_v20 = vadd.f32 %v93_v13, %v3603_v4 }
  0x36   :  { %v148_v13 = vrot.slane %v147_v3, 4 }
  0x37   :  { %v95_v27 = vadd.f32 %v94_v20, %v3609_v6 }
  0x38   :  { %v149_v17 = vmax.f32 %v147_v3, %v148_v13  ;;  %v365_v3 = vld [vmem:[%s4798_s6 + $0x10] sm:$0xff] }
  0x39   :  { %v96_v34 = vadd.f32 %v95_v27, %v3614_v7 }
  0x3a   :  { %v150_v27 = vrot.slane %v149_v17, 2 }
  0x3b   :  { %v97_v41 = vadd.f32 %v96_v34, %v3619_v8 }
  0x3c   :  { %v151_v31 = vmax.f32 %v149_v17, %v150_v27  ;;  %v367_v17 = vld [vmem:[%s4798_s6 + $0x20] sm:$0xff] }
  0x3d   :  { %v98_v49 = vadd.f32 %v97_v41, %v3629_v18 }
  0x3e   :  { %v152_v41 = vrot.slane %v151_v31, 1 }
  0x3f   :  { %v99_v53 = vadd.f32 %v98_v49, %v3635_v21 }
  0x40   :  { %v153_v44 = vmax.f32 %v151_v31, %v152_v41  ;;  %v369_v31 = vld [vmem:[%s4798_s6 + $0x30] sm:$0xff] }
  0x41   :  { %v100_v57 = vadd.f32 %v99_v53, %v3640_v23  ;;  %v243_v53 = vld [vmem:[%s4794_s2] sm:$0xff] }
  0x42   :  { %2664 = vmatpush3.msra.mxu1 %v243_v53 }
  0x43   :  { %v101_v59 = vadd.f32 %v100_v57, %v3645_v24  ;;  %v363_v57 = vld [vmem:[%s4798_s6] sm:$0xff] }
  0x45   :  { %v102_v1 = vadd.f32 %v101_v59, %v3655_v32  ;;  %v364_v59 = vld [vmem:[%s4798_s6 + $0x8] sm:$0xff] }
  0x46   :  { %v2902_v63 = vpack.c.bf16 %v364_v59, %v363_v57  ;;  %v374_v57 = vld [vmem:[%s4798_s6 + $0x58] sm:$0xff]  ;;  %v614_v59 = vld [vmem:[%s4795_s3 + $0x50] sm:$0xff] }
  0x47   :  { %v103_v2 = vadd.f32 %v102_v1, %v3661_v35  ;;  %v605_v1 = vld [vmem:[%s4795_s3 + $0x8] sm:$0xff] }
  0x48   :  { %2903 = vmatprep.subr.bf16.mxu1 %v2902_v63 }
  0x49   :  { %v104_v5 = vadd.f32 %v103_v2, %v3666_v37  ;;  %v2934_v2 = vpack.c.bf16 %v605_v1, %v604_v62 }
  0x4b   :  { %v105_v9 = vadd.f32 %v104_v5, %v3671_v38  ;;  %2935 = vmatprep.subr.bf16.mxu0 %v2934_v2  ;;  %v366_v5 = vld [vmem:[%s4798_s6 + $0x18] sm:$0xff] }
  0x4c   :  { %v2906_v13 = vpack.c.bf16 %v366_v5, %v365_v3  ;;  %v376_v3 = vld [vmem:[%s4798_s6 + $0x68] sm:$0xff]  ;;  %v616_v5 = vld [vmem:[%s4795_s3 + $0x60] sm:$0xff] }
  0x4d   :  { %v106_v14 = vadd.f32 %v105_v9, %v3691_v48  ;;  %v606_v9 = vld [vmem:[%s4795_s3 + $0x10] sm:$0xff] }
  0x4f   :  { %v107_v16 = vadd.f32 %v106_v14, %v3697_v50  ;;  %v607_v14 = vld [vmem:[%s4795_s3 + $0x18] sm:$0xff] }
  0x51   :  { %v108_v20 = vadd.f32 %v107_v16, %v3681_v45  ;;  %v2938_v16 = vpack.c.bf16 %v607_v14, %v606_v9 }
  0x53   :  { %v109_v25 = vadd.f32 %v108_v20, %v3686_v46  ;;  %v368_v20 = vld [vmem:[%s4798_s6 + $0x28] sm:$0xff] }
  0x54   :  { %v2910_v27 = vpack.c.bf16 %v368_v20, %v367_v17  ;;  %v378_v17 = vld [vmem:[%s4798_s6 + $0x78] sm:$0xff]  ;;  %v618_v20 = vld [vmem:[%s4795_s3 + $0x70] sm:$0xff] }
  0x55   :  { %v110_v28 = vrot.slane %v109_v25, 4 }
  0x57   :  { %v111_v30 = vadd.f32 %v110_v28, %v109_v25  ;;  %v608_v25 = vld [vmem:[%s4795_s3 + $0x20] sm:$0xff]  ;;  %v609_v28 = vld [vmem:[%s4795_s3 + $0x28] sm:$0xff] }
  0x59   :  { %v112_v34 = vrot.slane %v111_v30, 2 }
  0x5b   :  { %v113_v39 = vadd.f32 %v112_v34, %v111_v30  ;;  %v2942_v30 = vpack.c.bf16 %v609_v28, %v608_v25  ;;  %v370_v34 = vld [vmem:[%s4798_s6 + $0x38] sm:$0xff] }
  0x5c   :  { %v2914_v41 = vpack.c.bf16 %v370_v34, %v369_v31 }
  0x5d   :  { %v114_v42 = vrot.slane %v113_v39, 1 }
  0x5f   :  { %v115_v43 = vadd.f32 %v114_v42, %v113_v39  ;;  %v610_v39 = vld [vmem:[%s4795_s3 + $0x30] sm:$0xff]  ;;  %v611_v42 = vld [vmem:[%s4795_s3 + $0x38] sm:$0xff] }
  0x61   :  { %v116_v49 = vmul.f32 0.00390625, %v115_v43  ;;  %v2946_v43 = vpack.c.bf16 %v611_v42, %v610_v39 }
  0x63   :  { %v155_v52 = vsel %vm154_vm1, %v116_v49, %v153_v44  ;;  %v371_v44 = vld [vmem:[%s4798_s6 + $0x40] sm:$0xff]  ;;  %v372_v49 = vld [vmem:[%s4798_s6 + $0x48] sm:$0xff] }
  0x64   :  { %2661 = vmatmul.mubr.f32.vlgmr.msra.gmra.mrb[0].mxu0 %v155_v52  ;;  %v612_v52 = vld [vmem:[%s4795_s3 + $0x40] sm:$0xff]  ;;  %v2918_v53 = vpack.c.bf16 %v372_v49, %v371_v44  ;;  %v327_v49 = vlaneseq }
  0x65   :  { %2937 = vmatpush3.bf16.msra.mxu0 %v2934_v2  ;;  %v375_v2 = vld [vmem:[%s4798_s6 + $0x60] sm:$0xff] }
  0x66   :  { %2939 = vmatprep.subr.bf16.mxu0 %v2938_v16  ;;  %v2926_v9 = vpack.c.bf16 %v376_v3, %v375_v2 }
  0x69   :  { %2941 = vmatpush3.bf16.msra.mxu0 %v2938_v16  ;;  %v377_v16 = vld [vmem:[%s4798_s6 + $0x70] sm:$0xff] }
  0x6a   :  { %2943 = vmatprep.subr.bf16.mxu0 %v2942_v30  ;;  %v2930_v25 = vpack.c.bf16 %v378_v17, %v377_v16 }
  0x6d   :  { %2945 = vmatpush3.bf16.msra.mxu0 %v2942_v30 }
  0x6e   :  { %2947 = vmatprep.subr.bf16.mxu0 %v2946_v43 }
  0x71   :  { %2949 = vmatpush3.bf16.msra.mxu0 %v2946_v43 }
 0x137   :  { %v238_v54 = vpop.f32.mrb[0].mxu0 }
 0x138   :  { %v242_v55 = vmax.f32 %v238_v54, 0.0  ;;  %v2662_v56 = vpop.f32.mrb[1].mxu0  ;;  %v613_v54 = vld [vmem:[%s4795_s3 + $0x48] sm:$0xff] }
 0x139   :  { %v373_v56 = vld [vmem:[%s4798_s6 + $0x50] sm:$0xff] }
 0x13a   :  { %2666 = vmatmul.mubr.msk.f32.vlgmr.msra.gmra.mrb[0].mxu1 %vm244_vm2, %v242_v55  ;;  %v2950_v55 = vpack.c.bf16 %v613_v54, %v612_v52  ;;  %v2922_v62 = vpack.c.bf16 %v374_v57, %v373_v56  ;;  %v328_v52 = vshrl.u32 %v327_v49, 7  ;;  %v3815_v54 = vand.u32 127, %v327_v49 }
 0x13b   :  { %2905 = vmatpush3.bf16.msra.mxu1 %v2902_v63  ;;  %v615_v63 = vld [vmem:[%s4795_s3 + $0x58] sm:$0xff] }
 0x13c   :  { %2907 = vmatprep.subr.bf16.mxu1 %v2906_v13  ;;  %2951 = vmatprep.subr.bf16.mxu0 %v2950_v55  ;;  %v2954_v1 = vpack.c.bf16 %v615_v63, %v614_v59  ;;  %vm944_vm3 = vcmp.ge.s32.totalorder %v3815_v54, 64  ;;  %vm847_vm4 = vcmp.lt.s32.totalorder %v3815_v54, 64 }
 0x13d   :  { %2953 = vmatpush3.bf16.msra.mxu0 %v2950_v55 }
 0x13e   :  { %2955 = vmatprep.subr.bf16.mxu0 %v2954_v1 }
 0x13f   :  { %2909 = vmatpush3.bf16.msra.mxu1 %v2906_v13  ;;  %v617_v13 = vld [vmem:[%s4795_s3 + $0x68] sm:$0xff] }
 0x140   :  { %2911 = vmatprep.subr.bf16.mxu1 %v2910_v27  ;;  %v2958_v14 = vpack.c.bf16 %v617_v13, %v616_v5 }
 0x141   :  { %2957 = vmatpush3.bf16.msra.mxu0 %v2954_v1 }
 0x142   :  { %2959 = vmatprep.subr.bf16.mxu0 %v2958_v14 }
 0x143   :  { %2913 = vmatpush3.bf16.msra.mxu1 %v2910_v27  ;;  %v619_v27 = vld [vmem:[%s4795_s3 + $0x78] sm:$0xff] }
 0x144   :  { %2915 = vmatprep.subr.bf16.mxu1 %v2914_v41  ;;  %v2962_v28 = vpack.c.bf16 %v619_v27, %v618_v20 }
 0x145   :  { %2961 = vmatpush3.bf16.msra.mxu0 %v2958_v14 }
 0x146   :  { %2963 = vmatprep.subr.bf16.mxu0 %v2962_v28 }
 0x147   :  { %2917 = vmatpush3.bf16.msra.mxu1 %v2914_v41 }
 0x148   :  { %2919 = vmatprep.subr.bf16.mxu1 %v2918_v53 }
 0x149   :  { %2965 = vmatpush3.bf16.msra.mxu0 %v2962_v28 }
 0x14a   :  { %2966 = vmatprep.subr.bf16.mxu0 %v4802_v0 }
 0x14b   :  { %2921 = vmatpush3.bf16.msra.mxu1 %v2918_v53  ;;  %v329_v53 = vsub.s32 0, %v328_v52 }
 0x14c   :  { %2923 = vmatprep.subr.bf16.mxu1 %v2922_v62 }
 0x14f   :  { %2925 = vmatpush3.bf16.msra.mxu1 %v2922_v62 }
 0x150   :  { %2927 = vmatprep.subr.bf16.mxu1 %v2926_v9 }
 0x153   :  { %2929 = vmatpush3.bf16.msra.mxu1 %v2926_v9 }
 0x154   :  { %2931 = vmatprep.subr.bf16.mxu1 %v2930_v25 }
 0x157   :  { %2933 = vmatpush3.bf16.msra.mxu1 %v2930_v25 }
 0x158   :  { %3094 = vmatprep.subr.bf16.mxu1 %v4802_v0 }
 0x20d   :  { %v314_v30 = vpop.f32.mrb[0].mxu1 }
 0x20e   :  { %v319_v31 = vrot.slane %v314_v30, 1  ;;  %v2667_v34 = vpop.f32.mrb[1].mxu1 }
 0x210   :  { %v321_v39 = vadd.f32 %v319_v31, %v314_v30 }
 0x212   :  { %v322_v41 = vsub.f32 0.0, %v321_v39 }
 0x214   :  { %v323_v42 = vmul.f32 1.442695, %v322_v41 }
 0x216   :  { %3183 = vpow2.f32 %v323_v42 }
 0x220   :  { %v3184_v43 = vpop.eup %3183 }
 0x221   :  { %v325_v44 = vadd.f32 1.0, %v3184_v43 }
 0x223   :  { %3185 = vrcp.f32 %v325_v44 }
 0x22d   :  { %v3186_v55 = vpop.eup %3185 }
 0x22e   :  { %v3817_v56 = vrot.slane %v3186_v55, %v329_v53 }
 0x230   :  { %v331_v57 = vmul.f32 %v3817_v56, %v3457_v10  ;;  %v332_v59 = vmul.f32 %v3817_v56, %v3462_v11  ;;  %v333_v1 = vmul.f32 %v3817_v56, %v3467_v12  ;;  %v334_v10 = vmul.f32 %v3817_v56, %v3474_v15 }
 0x231   :  { %v335_v3 = vmul.f32 %v3817_v56, %v3487_v19  ;;  %v336_v12 = vmul.f32 %v3817_v56, %v3493_v22  ;;  %v3845_v5 = vmul.f32 %v3817_v56, %v3506_v26  ;;  %v3849_v9 = vmul.f32 %v3817_v56, %v3512_v29 }
 0x232   :  { %2700 = vmatprep.mubr.f32.mxu1 %v331_v57  ;;  %2780 = vmatprep.mubr.f32.mxu0 %v331_v57  ;;  %v945_v62 = vsel %vm944_vm3, %v331_v57, -inf  ;;  %v848_v63 = vsel %vm847_vm4, %v331_v57, -inf  ;;  %v946_v11 = vsel %vm944_vm3, %v332_v59, -inf  ;;  %v849_v2 = vsel %vm847_vm4, %v332_v59, -inf }
 0x233   :  { %977 = vmax.xlane.f32.xlu1 %v945_v62  ;;  %880 = vmax.xlane.f32.xlu0 %v848_v63  ;;  %v851_v15 = vsel %vm847_vm4, %v334_v10, -inf  ;;  %v850_v19 = vsel %vm847_vm4, %v333_v1, -inf  ;;  %v948_v22 = vsel %vm944_vm3, %v334_v10, -inf  ;;  %v947_v13 = vsel %vm944_vm3, %v333_v1, -inf }
 0x234   :  { %2701 = vmatmul.mubr.f32.vlgmr.msra.gmra.mrb[2].mxu1 %v332_v59  ;;  %2781 = vmatmul.mubr.f32.vlgmr.msra.gmra.mrb[2].mxu0 %v332_v59  ;;  %v3859_v14 = vmul.f32 %v3817_v56, %v3525_v33  ;;  %v3863_v26 = vmul.f32 %v3817_v56, %v3531_v36  ;;  %v3867_v29 = vmul.f32 %v3817_v56, %v3544_v40  ;;  %v853_v33 = vsel %vm847_vm4, %v336_v12, -inf }
 0x235   :  { %2703 = vmatprep.mubr.f32.mxu1 %v333_v1  ;;  %2783 = vmatprep.mubr.f32.mxu0 %v333_v1  ;;  %v3871_v16 = vmul.f32 %v3817_v56, %v3558_v47  ;;  %v3875_v17 = vmul.f32 %v3817_v56, %v3571_v51  ;;  %v3881_v36 = vmul.f32 %v3817_v56, %v3603_v4  ;;  %v852_v51 = vsel %vm847_vm4, %v335_v3, -inf }
 0x236   :  { %v3885_v40 = vmul.f32 %v3817_v56, %v3609_v6  ;;  %v3889_v47 = vmul.f32 %v3817_v56, %v3614_v7  ;;  %v3895_v20 = vmul.f32 %v3817_v56, %v3619_v8  ;;  %v3899_v4 = vmul.f32 %v3817_v56, %v3629_v18 }
 0x237   :  { %979 = vmax.xlane.f32.xlu1 %v946_v11  ;;  %882 = vmax.xlane.f32.xlu0 %v849_v2  ;;  %v3903_v6 = vmul.f32 %v3817_v56, %v3635_v21  ;;  %v950_v7 = vsel %vm944_vm3, %v336_v12, -inf  ;;  %v3911_v25 = vmul.f32 %v3817_v56, %v3640_v23  ;;  %v3915_v8 = vmul.f32 %v3817_v56, %v3645_v24 }
 0x238   :  { %2704 = vmatmul.mubr.f32.gmra.mrb[4].mxu1 %v334_v10  ;;  %2784 = vmatmul.mubr.f32.gmra.mrb[4].mxu0 %v334_v10  ;;  %v3919_v18 = vmul.f32 %v3817_v56, %v3655_v32  ;;  %v3923_v21 = vmul.f32 %v3817_v56, %v3661_v35  ;;  %v3927_v27 = vmul.f32 %v3817_v56, %v3666_v37  ;;  %v949_v32 = vsel %vm944_vm3, %v335_v3, -inf }
 0x239   :  { %2706 = vmatprep.mubr.f32.mxu1 %v335_v3  ;;  %2786 = vmatprep.mubr.f32.mxu0 %v335_v3  ;;  %v3931_v23 = vmul.f32 %v3817_v56, %v3671_v38  ;;  %v3935_v24 = vmul.f32 %v3817_v56, %v3691_v48  ;;  %v3941_v35 = vmul.f32 %v3817_v56, %v3697_v50  ;;  %v3956_v48 = vsel %vm847_vm4, %v3885_v40, -inf }
 0x23a   :  { %v3945_v37 = vmul.f32 %v3817_v56, %v3681_v45  ;;  %v3949_v38 = vmul.f32 %v3817_v56, %v3686_v46  ;;  %v3961_v50 = vsel %vm847_vm4, %v3881_v36, -inf  ;;  %v3966_v45 = vsel %vm944_vm3, %v3885_v40, -inf }
 0x23b   :  { %886 = vmax.xlane.f32.xlu1 %v851_v15  ;;  %884 = vmax.xlane.f32.xlu0 %v850_v19  ;;  %v3971_v46 = vsel %vm944_vm3, %v3881_v36, -inf  ;;  %v3978_v28 = vsel %vm847_vm4, %v3895_v20, -inf  ;;  %v3983_v30 = vsel %vm847_vm4, %v3889_v47, -inf  ;;  %v3988_v31 = vsel %vm944_vm3, %v3895_v20, -inf }
 0x23c   :  { %2707 = vmatmul.mubr.f32.gmra.mrb[6].mxu1 %v336_v12  ;;  %2787 = vmatmul.mubr.f32.gmra.mrb[6].mxu0 %v336_v12  ;;  %v3993_v34 = vsel %vm944_vm3, %v3889_v47, -inf  ;;  %v3998_v39 = vsel %vm847_vm4, %v3903_v6, -inf  ;;  %v4003_v41 = vsel %vm847_vm4, %v3899_v4, -inf  ;;  %v4008_v42 = vsel %vm944_vm3, %v3903_v6, -inf }
 0x23d   :  { %2709 = vmatprep.mubr.f32.mxu1 %v3845_v5  ;;  %2789 = vmatprep.mubr.f32.mxu0 %v3845_v5  ;;  %v4013_v43 = vsel %vm944_vm3, %v3899_v4, -inf  ;;  %v4018_v44 = vsel %vm847_vm4, %v3915_v8, -inf  ;;  %v4023_v49 = vsel %vm847_vm4, %v3911_v25, -inf  ;;  %v4028_v52 = vsel %vm944_vm3, %v3915_v8, -inf }
 0x23e   :  { %v4033_v53 = vsel %vm944_vm3, %v3911_v25, -inf  ;;  %v4040_v55 = vsel %vm847_vm4, %v3923_v21, -inf  ;;  %v4045_v57 = vsel %vm847_vm4, %v3919_v18, -inf  ;;  %v4050_v59 = vsel %vm944_vm3, %v3923_v21, -inf }
 0x23f   :  { %983 = vmax.xlane.f32.xlu1 %v948_v22  ;;  %981 = vmax.xlane.f32.xlu0 %v947_v13  ;;  %v4055_v62 = vsel %vm944_vm3, %v3919_v18, -inf  ;;  %v4062_v63 = vsel %vm847_vm4, %v3931_v23, -inf  ;;  %v4067_v1 = vsel %vm847_vm4, %v3927_v27, -inf  ;;  %v4072_v10 = vsel %vm944_vm3, %v3931_v23, -inf }
 0x240   :  { %2710 = vmatmul.mubr.f32.gmra.mrb[8].mxu1 %v3849_v9  ;;  %2790 = vmatmul.mubr.f32.gmra.mrb[8].mxu0 %v3849_v9  ;;  %v4077_v11 = vsel %vm944_vm3, %v3927_v27, -inf  ;;  %v4082_v2 = vsel %vm847_vm4, %v3941_v35, -inf  ;;  %v4087_v3 = vsel %vm847_vm4, %v3935_v24, -inf  ;;  %v4092_v12 = vsel %vm944_vm3, %v3941_v35, -inf }
 0x241   :  { %2712 = vmatprep.mubr.f32.mxu1 %v3859_v14  ;;  %2792 = vmatprep.mubr.f32.mxu0 %v3859_v14  ;;  %v4097_v15 = vsel %vm944_vm3, %v3935_v24, -inf  ;;  %v4102_v19 = vsel %vm847_vm4, %v3949_v38, -inf  ;;  %v4107_v22 = vsel %vm847_vm4, %v3945_v37, -inf  ;;  %v4112_v13 = vsel %vm944_vm3, %v3949_v38, -inf }
 0x242   :  { %v4133_v0 = vmul.f32 %v3817_v56, %v3588_v60  ;;  %v857_v60 = vsel %vm847_vm4, %v3863_v26, -inf }
 0x243   :  { %890 = vmax.xlane.f32.xlu1 %v853_v33  ;;  %888 = vmax.xlane.f32.xlu0 %v852_v51  ;;  %v4117_v33 = vsel %vm944_vm3, %v3945_v37, -inf  ;;  %v855_v51 = vsel %vm847_vm4, %v3849_v9, -inf }
 0x244   :  { %2713 = vmatmul.mubr.f32.gmra.mrb[10].mxu1 %v3863_v26  ;;  %2793 = vmatmul.mubr.f32.gmra.mrb[10].mxu0 %v3863_v26  ;;  %4804 = vst [vmem:[#allocation8_spill] sm:$0xff] %v4117_v33  ;;  %v952_v33 = vsel %vm944_vm3, %v3849_v9, -inf  ;;  %v859_v9 = vsel %vm847_vm4, %v3871_v16, -inf }
 0x245   :  { %2715 = vmatprep.mubr.f32.mxu1 %v3867_v29  ;;  %2795 = vmatprep.mubr.f32.mxu0 %v3867_v29 }
 0x247   :  { %987 = vmax.xlane.f32.xlu1 %v950_v7  ;;  %985 = vmax.xlane.f32.xlu0 %v949_v32  ;;  %v854_v7 = vsel %vm847_vm4, %v3845_v5, -inf  ;;  %v344_v32 = vmul.f32 %v3817_v56, %v3581_v58  ;;  %v951_v58 = vsel %vm944_vm3, %v3845_v5, -inf  ;;  %v856_v5 = vsel %vm847_vm4, %v3859_v14, -inf }
 0x248   :  { %2716 = vmatmul.mubr.f32.gmra.mrb[12].mxu1 %v3871_v16  ;;  %2796 = vmatmul.mubr.f32.gmra.mrb[12].mxu0 %v3871_v16 }
 0x249   :  { %2718 = vmatprep.mubr.f32.mxu1 %v3875_v17  ;;  %2798 = vmatprep.mubr.f32.mxu0 %v3875_v17 }
 0x24b   :  { %894 = vmax.xlane.f32.xlu1 %v855_v51  ;;  %892 = vmax.xlane.f32.xlu0 %v854_v7  ;;  %v4145_v51 = vmul.f32 %v3817_v56, %v3593_v61  ;;  %v954_v61 = vsel %vm944_vm3, %v3863_v26, -inf  ;;  %v953_v56 = vsel %vm944_vm3, %v3859_v14, -inf  ;;  %v858_v26 = vsel %vm847_vm4, %v3867_v29, -inf }
 0x24c   :  { %2719 = vmatmul.mubr.f32.gmra.mrb[14].mxu1 %v344_v32  ;;  %2799 = vmatmul.mubr.f32.gmra.mrb[14].mxu0 %v344_v32  ;;  %v956_v14 = vsel %vm944_vm3, %v3871_v16, -inf  ;;  %v860_v16 = vsel %vm847_vm4, %v3875_v17, -inf }
 0x24d   :  { %2721 = vmatprep.mubr.f32.mxu1 %v4133_v0  ;;  %2801 = vmatprep.mubr.f32.mxu0 %v4133_v0 }
 0x24f   :  { %991 = vmax.xlane.f32.xlu1 %v952_v33  ;;  %989 = vmax.xlane.f32.xlu0 %v951_v58  ;;  %v4806_v33 = vmov 0.0|0.0  }
 0x250   :  { %2722 = vmatmul.mubr.f32.gmra.mrb[16].mxu1 %v4145_v51  ;;  %2802 = vmatmul.mubr.f32.gmra.mrb[16].mxu0 %v4145_v51 }
 0x251   :  { %2724 = vmatprep.mubr.f32.mxu1 %v3881_v36  ;;  %2804 = vmatprep.mubr.f32.mxu0 %v3881_v36  ;;  %v955_v36 = vsel %vm944_vm3, %v3867_v29, -inf  ;;  %v958_v29 = vsel %vm944_vm3, %v344_v32, -inf }
 0x253   :  { %898 = vmax.xlane.f32.xlu1 %v857_v60  ;;  %896 = vmax.xlane.f32.xlu0 %v856_v5 }
 0x254   :  { %2725 = vmatmul.mubr.f32.gmra.mrb[18].mxu1 %v3885_v40  ;;  %2805 = vmatmul.mubr.f32.gmra.mrb[18].mxu0 %v3885_v40  ;;  %v861_v40 = vsel %vm847_vm4, %v344_v32, -inf }
 0x255   :  { %2727 = vmatprep.mubr.f32.mxu1 %v3889_v47  ;;  %2807 = vmatprep.mubr.f32.mxu0 %v3889_v47  ;;  %v957_v47 = vsel %vm944_vm3, %v3875_v17, -inf  ;;  %v960_v17 = vsel %vm944_vm3, %v4145_v51, -inf }
 0x257   :  { %995 = vmax.xlane.f32.xlu1 %v954_v61  ;;  %993 = vmax.xlane.f32.xlu0 %v953_v56 }
 0x258   :  { %2728 = vmatmul.mubr.f32.gmra.mrb[20].mxu1 %v3895_v20  ;;  %2808 = vmatmul.mubr.f32.gmra.mrb[20].mxu0 %v3895_v20  ;;  %v863_v20 = vsel %vm847_vm4, %v4145_v51, -inf }
 0x259   :  { %2730 = vmatprep.mubr.f32.mxu1 %v3899_v4  ;;  %2810 = vmatprep.mubr.f32.mxu0 %v3899_v4  ;;  %v862_v4 = vsel %vm847_vm4, %v4133_v0, -inf }
 0x25b   :  { %902 = vmax.xlane.f32.xlu1 %v859_v9  ;;  %900 = vmax.xlane.f32.xlu0 %v858_v26 }
 0x25c   :  { %2731 = vmatmul.mubr.f32.gmra.mrb[22].mxu1 %v3903_v6  ;;  %2811 = vmatmul.mubr.f32.gmra.mrb[22].mxu0 %v3903_v6  ;;  %v959_v6 = vsel %vm944_vm3, %v4133_v0, -inf  ;;  %v4805_v0 = vld [vmem:[#allocation8_spill] sm:$0xff] }
 0x25d   :  { %2733 = vmatprep.mubr.f32.mxu1 %v3911_v25  ;;  %2813 = vmatprep.mubr.f32.mxu0 %v3911_v25 }
 0x25f   :  { %999 = vmax.xlane.f32.xlu1 %v956_v14  ;;  %997 = vmax.xlane.f32.xlu0 %v955_v36 }
 0x260   :  { %2734 = vmatmul.mubr.f32.gmra.mrb[24].mxu1 %v3915_v8  ;;  %2814 = vmatmul.mubr.f32.gmra.mrb[24].mxu0 %v3915_v8 }
 0x261   :  { %2736 = vmatprep.mubr.f32.mxu1 %v3919_v18  ;;  %2816 = vmatprep.mubr.f32.mxu0 %v3919_v18 }
 0x263   :  { %906 = vmax.xlane.f32.xlu1 %v861_v40  ;;  %904 = vmax.xlane.f32.xlu0 %v860_v16 }
 0x264   :  { %2737 = vmatmul.mubr.f32.gmra.mrb[26].mxu1 %v3923_v21  ;;  %2817 = vmatmul.mubr.f32.gmra.mrb[26].mxu0 %v3923_v21 }
 0x265   :  { %2739 = vmatprep.mubr.f32.mxu1 %v3927_v27  ;;  %2819 = vmatprep.mubr.f32.mxu0 %v3927_v27  ;;  %v1139_v27 = vld [vmem:[#allocation2 + $0x208] sm:$0xff] }
 0x267   :  { %1003 = vmax.xlane.f32.xlu1 %v958_v29  ;;  %1001 = vmax.xlane.f32.xlu0 %v957_v47 }
 0x268   :  { %2740 = vmatmul.mubr.f32.gmra.mrb[28].mxu1 %v3931_v23  ;;  %2820 = vmatmul.mubr.f32.gmra.mrb[28].mxu0 %v3931_v23 }
 0x269   :  { %2742 = vmatprep.mubr.f32.mxu1 %v3935_v24  ;;  %2822 = vmatprep.mubr.f32.mxu0 %v3935_v24 }
 0x26b   :  { %910 = vmax.xlane.f32.xlu1 %v863_v20  ;;  %908 = vmax.xlane.f32.xlu0 %v862_v4 }
 0x26c   :  { %2743 = vmatmul.mubr.f32.gmra.mrb[30].mxu1 %v3941_v35  ;;  %2823 = vmatmul.mubr.f32.gmra.mrb[30].mxu0 %v3941_v35 }
 0x26d   :  { %2745 = vmatprep.mubr.f32.mxu1 %v3945_v37  ;;  %2825 = vmatprep.mubr.f32.mxu0 %v3945_v37 }
 0x26f   :  { %1007 = vmax.xlane.f32.xlu1 %v960_v17  ;;  %1005 = vmax.xlane.f32.xlu0 %v959_v6 }
 0x270   :  { %2746 = vmatmul.mubr.f32.gmra.mrb[32].mxu1 %v3949_v38  ;;  %2826 = vmatmul.mubr.f32.gmra.mrb[32].mxu0 %v3949_v38 }
 0x271   :  { %1346 = vmatprep.mubr.f32.mxu1 %v1139_v27 }
 0x273   :  { %914 = vmax.xlane.f32.xlu1 %v3956_v48  ;;  %912 = vmax.xlane.f32.xlu0 %v3961_v50 }
 0x277   :  { %1011 = vmax.xlane.f32.xlu1 %v3966_v45  ;;  %1009 = vmax.xlane.f32.xlu0 %v3971_v46 }
 0x27b   :  { %918 = vmax.xlane.f32.xlu1 %v3978_v28  ;;  %916 = vmax.xlane.f32.xlu0 %v3983_v30 }
 0x27f   :  { %1015 = vmax.xlane.f32.xlu1 %v3988_v31  ;;  %1013 = vmax.xlane.f32.xlu0 %v3993_v34 }
 0x283   :  { %922 = vmax.xlane.f32.xlu1 %v3998_v39  ;;  %920 = vmax.xlane.f32.xlu0 %v4003_v41 }
 0x287   :  { %1019 = vmax.xlane.f32.xlu1 %v4008_v42  ;;  %1017 = vmax.xlane.f32.xlu0 %v4013_v43 }
 0x28b   :  { %926 = vmax.xlane.f32.xlu1 %v4018_v44  ;;  %924 = vmax.xlane.f32.xlu0 %v4023_v49 }
 0x28f   :  { %1023 = vmax.xlane.f32.xlu1 %v4028_v52  ;;  %1021 = vmax.xlane.f32.xlu0 %v4033_v53 }
 0x293   :  { %930 = vmax.xlane.f32.xlu1 %v4040_v55  ;;  %928 = vmax.xlane.f32.xlu0 %v4045_v57 }
 0x297   :  { %1027 = vmax.xlane.f32.xlu1 %v4050_v59  ;;  %1025 = vmax.xlane.f32.xlu0 %v4055_v62 }
 0x29b   :  { %934 = vmax.xlane.f32.xlu1 %v4062_v63  ;;  %932 = vmax.xlane.f32.xlu0 %v4067_v1  ;;  %v1075_v1 = vld [vmem:[#allocation2 + $0x8] sm:$0xff] }
 0x29c   :  { %1266 = vmatprep.mubr.f32.mxu0 %v1075_v1 }
 0x29f   :  { %1031 = vmax.xlane.f32.xlu1 %v4072_v10  ;;  %1029 = vmax.xlane.f32.xlu0 %v4077_v11 }
 0x2a3   :  { %938 = vmax.xlane.f32.xlu1 %v4082_v2  ;;  %936 = vmax.xlane.f32.xlu0 %v4087_v3 }
 0x2a7   :  { %1035 = vmax.xlane.f32.xlu1 %v4092_v12  ;;  %1033 = vmax.xlane.f32.xlu0 %v4097_v15 }
 0x2ab   :  { %942 = vmax.xlane.f32.xlu1 %v4102_v19  ;;  %940 = vmax.xlane.f32.xlu0 %v4107_v22 }
 0x2af   :  { %1039 = vmax.xlane.f32.xlu1 %v4112_v13  ;;  %1037 = vmax.xlane.f32.xlu0 %v4805_v0 }
 0x2c0   :  { %v978_v54 = vpop.xlane.xlu1 %977  ;;  %v881_v25 = vpop.xlane.xlu0 %880 }
 0x2c1   :  { %v4260_v8 = vsel %vm1041_vm5, %v881_v25, %v978_v54 }
 0x2c4   :  { %v4262_v18 = vpop.xlane.xlu1 %979  ;;  %v4264_v21 = vpop.xlane.xlu0 %882 }
 0x2c8   :  { %v4266_v23 = vpop.xlane.xlu1 %886  ;;  %v4268_v24 = vpop.xlane.xlu0 %884 }
 0x2cc   :  { %v4270_v35 = vpop.xlane.xlu1 %983  ;;  %v4272_v37 = vpop.xlane.xlu0 %981 }
 0x2d0   :  { %v4274_v38 = vpop.xlane.xlu1 %890  ;;  %v4276_v48 = vpop.xlane.xlu0 %888 }
 0x2d4   :  { %v4278_v50 = vpop.xlane.xlu1 %987  ;;  %v4280_v45 = vpop.xlane.xlu0 %985 }
 0x2d8   :  { %v4282_v46 = vpop.xlane.xlu1 %894  ;;  %v4284_v28 = vpop.xlane.xlu0 %892 }
 0x2dc   :  { %v4286_v30 = vpop.xlane.xlu1 %991  ;;  %v4288_v31 = vpop.xlane.xlu0 %989 }
 0x2e0   :  { %v4290_v34 = vpop.xlane.xlu1 %898  ;;  %v4292_v39 = vpop.xlane.xlu0 %896 }
 0x2e4   :  { %v4294_v41 = vpop.xlane.xlu1 %995  ;;  %v4296_v42 = vpop.xlane.xlu0 %993 }
 0x2e8   :  { %v4298_v43 = vpop.xlane.xlu1 %902  ;;  %v4300_v44 = vpop.xlane.xlu0 %900 }
 0x2ec   :  { %v4302_v49 = vpop.xlane.xlu1 %999  ;;  %v4304_v52 = vpop.xlane.xlu0 %997 }
 0x2f0   :  { %v4306_v53 = vpop.xlane.xlu1 %906  ;;  %v4308_v55 = vpop.xlane.xlu0 %904 }
 0x2f4   :  { %v4310_v57 = vpop.xlane.xlu1 %1003  ;;  %v4312_v59 = vpop.xlane.xlu0 %1001 }
 0x2f8   :  { %v4318_v3 = vpop.xlane.xlu1 %910  ;;  %v4320_v12 = vpop.xlane.xlu0 %908 }
 0x2fc   :  { %v4334_v61 = vpop.xlane.xlu1 %1007  ;;  %v4336_v56 = vpop.xlane.xlu0 %1005 }
 0x300   :  { %v4350_v17 = vpop.xlane.xlu1 %914  ;;  %v4352_v6 = vpop.xlane.xlu0 %912 }
 0x307   :  { %v4314_v62 = vpop.f32.mrb[2].mxu1  ;;  %v2782_v63 = vpop.f32.mrb[2].mxu0 }
 0x308   :  { %v4316_v10 = vpop.f32.mrb[3].mxu1  ;;  %v686_v11 = vpop.f32.mrb[3].mxu0 }
 0x309   :  { %v2967_v2 = vpack.c.bf16 %v2782_v63, %v686_v11 }
 0x30b   :  { %v4322_v15 = vpop.f32.mrb[4].mxu1  ;;  %v2785_v19 = vpop.f32.mrb[4].mxu0  ;;  %2968 = vmatpush1.bf16.msra.mxu0 %v2967_v2  ;;  %3110 = vmatpush1.bf16.msra.mxu1 %v2967_v2 }
 0x30c   :  { %v4324_v22 = vpop.f32.mrb[5].mxu1  ;;  %v696_v13 = vpop.f32.mrb[5].mxu0  ;;  %2969 = vmatprep.subr.bf16.mxu0 %v4806_v33  ;;  %3095 = vmatprep.subr.bf16.mxu1 %v4806_v33 }
 0x30d   :  { %v2970_v7 = vpack.c.bf16 %v2785_v19, %v696_v13 }
 0x30f   :  { %v4328_v32 = vpop.f32.mrb[6].mxu1  ;;  %v2788_v58 = vpop.f32.mrb[6].mxu0  ;;  %2971 = vmatpush1.bf16.msra.mxu0 %v2970_v7  ;;  %3111 = vmatpush1.bf16.msra.mxu1 %v2970_v7 }
 0x310   :  { %v4330_v51 = vpop.f32.mrb[7].mxu1  ;;  %v706_v60 = vpop.f32.mrb[7].mxu0  ;;  %2972 = vmatprep.subr.bf16.mxu0 %v4806_v33  ;;  %3096 = vmatprep.subr.bf16.mxu1 %v4806_v33 }
 0x311   :  { %v2973_v5 = vpack.c.bf16 %v2788_v58, %v706_v60  ;;  %v4366_v7 = vpop.xlane.xlu1 %1011  ;;  %v4368_v58 = vpop.xlane.xlu0 %1009 }
 0x313   :  { %v4338_v9 = vpop.f32.mrb[8].mxu1  ;;  %v2791_v26 = vpop.f32.mrb[8].mxu0  ;;  %2974 = vmatpush1.bf16.msra.mxu0 %v2973_v5  ;;  %3112 = vmatpush1.bf16.msra.mxu1 %v2973_v5 }
 0x314   :  { %v4340_v14 = vpop.f32.mrb[9].mxu1  ;;  %v716_v36 = vpop.f32.mrb[9].mxu0  ;;  %2975 = vmatprep.subr.bf16.mxu0 %v4806_v33  ;;  %3097 = vmatprep.subr.bf16.mxu1 %v4806_v33 }
 0x315   :  { %v2976_v40 = vpack.c.bf16 %v2791_v26, %v716_v36 }
 0x317   :  { %v4344_v16 = vpop.f32.mrb[10].mxu1  ;;  %v2794_v29 = vpop.f32.mrb[10].mxu0  ;;  %2977 = vmatpush1.bf16.msra.mxu0 %v2976_v40  ;;  %3113 = vmatpush1.bf16.msra.mxu1 %v2976_v40 }
 0x318   :  { %v4346_v47 = vpop.f32.mrb[11].mxu1  ;;  %v726_v20 = vpop.f32.mrb[11].mxu0  ;;  %2978 = vmatprep.subr.bf16.mxu0 %v4806_v33  ;;  %3098 = vmatprep.subr.bf16.mxu1 %v4806_v33 }
 0x319   :  { %4807 = vst [vmem:[#allocation8_spill] sm:$0xff] %v4346_v47  ;;  %v2979_v4 = vpack.c.bf16 %v2794_v29, %v726_v20  ;;  %v1079_v47 = vld [vmem:[#allocation2 + $0x28] sm:$0xff] }
 0x31b   :  { %v4354_v0 = vpop.f32.mrb[12].mxu1  ;;  %v2797_v54 = vpop.f32.mrb[12].mxu0  ;;  %2980 = vmatpush1.bf16.msra.mxu0 %v2979_v4  ;;  %3114 = vmatpush1.bf16.msra.mxu1 %v2979_v4 }
 0x31c   :  { %4808 = vst [vmem:[#allocation9_spill] sm:$0xff] %v4354_v0  ;;  %v4356_v25 = vpop.f32.mrb[13].mxu1  ;;  %v736_v27 = vpop.f32.mrb[13].mxu0  ;;  %2981 = vmatprep.subr.bf16.mxu0 %v4806_v33  ;;  %3099 = vmatprep.subr.bf16.mxu1 %v4806_v33 }
 0x31d   :  { %4809 = vst [vmem:[#allocation10_spill] sm:$0xff] %v4356_v25  ;;  %v2982_v63 = vpack.c.bf16 %v2797_v54, %v736_v27 }
 0x31f   :  { %v4360_v1 = vpop.f32.mrb[14].mxu1  ;;  %v2800_v11 = vpop.f32.mrb[14].mxu0  ;;  %2983 = vmatpush1.bf16.msra.mxu0 %v2982_v63  ;;  %3115 = vmatpush1.bf16.msra.mxu1 %v2982_v63 }
 0x320   :  { %4810 = vst [vmem:[#allocation11_spill] sm:$0xff] %v4360_v1  ;;  %v4362_v2 = vpop.f32.mrb[15].mxu1  ;;  %v746_v19 = vpop.f32.mrb[15].mxu0  ;;  %2984 = vmatprep.subr.bf16.mxu0 %v4806_v33  ;;  %3100 = vmatprep.subr.bf16.mxu1 %v4806_v33 }
 0x321   :  { %4811 = vst [vmem:[#allocation12_spill] sm:$0xff] %v4362_v2  ;;  %v2985_v13 = vpack.c.bf16 %v2800_v11, %v746_v19  ;;  %v4382_v63 = vpop.xlane.xlu1 %918  ;;  %v4384_v11 = vpop.xlane.xlu0 %916 }
 0x323   :  { %v4370_v60 = vpop.f32.mrb[16].mxu1  ;;  %v2803_v5 = vpop.f32.mrb[16].mxu0  ;;  %2986 = vmatpush1.bf16.msra.mxu0 %v2985_v13  ;;  %3116 = vmatpush1.bf16.msra.mxu1 %v2985_v13 }
 0x324   :  { %4812 = vst [vmem:[#allocation13_spill] sm:$0xff] %v4370_v60  ;;  %v4372_v26 = vpop.f32.mrb[17].mxu1  ;;  %v756_v36 = vpop.f32.mrb[17].mxu0  ;;  %2987 = vmatprep.subr.bf16.mxu0 %v4806_v33  ;;  %3101 = vmatprep.subr.bf16.mxu1 %v4806_v33 }
 0x325   :  { %4813 = vst [vmem:[#allocation14_spill] sm:$0xff] %v4372_v26  ;;  %v2988_v40 = vpack.c.bf16 %v2803_v5, %v756_v36 }
 0x327   :  { %v4376_v29 = vpop.f32.mrb[18].mxu1  ;;  %v2806_v20 = vpop.f32.mrb[18].mxu0  ;;  %2989 = vmatpush1.bf16.msra.mxu0 %v2988_v40  ;;  %3117 = vmatpush1.bf16.msra.mxu1 %v2988_v40 }
 0x328   :  { %4814 = vst [vmem:[#allocation15_spill] sm:$0xff] %v4376_v29  ;;  %v4378_v4 = vpop.f32.mrb[19].mxu1  ;;  %v766_v54 = vpop.f32.mrb[19].mxu0  ;;  %2990 = vmatprep.subr.bf16.mxu0 %v4806_v33  ;;  %3102 = vmatprep.subr.bf16.mxu1 %v4806_v33 }
 0x329   :  { %4815 = vst [vmem:[#allocation16_spill] sm:$0xff] %v4378_v4  ;;  %v2991_v27 = vpack.c.bf16 %v2806_v20, %v766_v54 }
 0x32b   :  { %v4386_v19 = vpop.f32.mrb[20].mxu1  ;;  %v2809_v13 = vpop.f32.mrb[20].mxu0  ;;  %2992 = vmatpush1.bf16.msra.mxu0 %v2991_v27  ;;  %3118 = vmatpush1.bf16.msra.mxu1 %v2991_v27 }
 0x32c   :  { %4816 = vst [vmem:[#allocation17_spill] sm:$0xff] %v4386_v19  ;;  %v4388_v5 = vpop.f32.mrb[21].mxu1  ;;  %v776_v36 = vpop.f32.mrb[21].mxu0  ;;  %2993 = vmatprep.subr.bf16.mxu0 %v4806_v33  ;;  %3103 = vmatprep.subr.bf16.mxu1 %v4806_v33 }
 0x32d   :  { %4817 = vst [vmem:[#allocation18_spill] sm:$0xff] %v4388_v5  ;;  %v2994_v40 = vpack.c.bf16 %v2809_v13, %v776_v36  ;;  %v4398_v5 = vpop.xlane.xlu1 %1015  ;;  %v4400_v19 = vpop.xlane.xlu0 %1013 }
 0x32f   :  { %v4392_v4 = vpop.f32.mrb[22].mxu1  ;;  %v2812_v20 = vpop.f32.mrb[22].mxu0  ;;  %2995 = vmatpush1.bf16.msra.mxu0 %v2994_v40  ;;  %3119 = vmatpush1.bf16.msra.mxu1 %v2994_v40 }
 0x330   :  { %4818 = vst [vmem:[#allocation19_spill] sm:$0xff] %v4392_v4  ;;  %v4394_v54 = vpop.f32.mrb[23].mxu1  ;;  %v786_v29 = vpop.f32.mrb[23].mxu0  ;;  %2996 = vmatprep.subr.bf16.mxu0 %v4806_v33  ;;  %3104 = vmatprep.subr.bf16.mxu1 %v4806_v33 }
 0x331   :  { %4819 = vst [vmem:[#allocation20_spill] sm:$0xff] %v4394_v54  ;;  %v2997_v27 = vpack.c.bf16 %v2812_v20, %v786_v29 }
 0x333   :  { %v4402_v26 = vpop.f32.mrb[24].mxu1  ;;  %v2815_v13 = vpop.f32.mrb[24].mxu0  ;;  %2998 = vmatpush1.bf16.msra.mxu0 %v2997_v27  ;;  %3120 = vmatpush1.bf16.msra.mxu1 %v2997_v27 }
 0x334   :  { %4820 = vst [vmem:[#allocation21_spill] sm:$0xff] %v4402_v26  ;;  %v4404_v36 = vpop.f32.mrb[25].mxu1  ;;  %v796_v40 = vpop.f32.mrb[25].mxu0  ;;  %2999 = vmatprep.subr.bf16.mxu0 %v4806_v33  ;;  %3105 = vmatprep.subr.bf16.mxu1 %v4806_v33 }
 0x335   :  { %4821 = vst [vmem:[#allocation22_spill] sm:$0xff] %v4404_v36  ;;  %v3000_v54 = vpack.c.bf16 %v2815_v13, %v796_v40  ;;  %v4414_v36 = vpop.xlane.xlu1 %922  ;;  %v4416_v26 = vpop.xlane.xlu0 %920 }
 0x337   :  { %v4408_v4 = vpop.f32.mrb[26].mxu1  ;;  %v2818_v29 = vpop.f32.mrb[26].mxu0  ;;  %3001 = vmatpush1.bf16.msra.mxu0 %v3000_v54  ;;  %3121 = vmatpush1.bf16.msra.mxu1 %v3000_v54 }
 0x338   :  { %4822 = vst [vmem:[#allocation23_spill] sm:$0xff] %v4408_v4  ;;  %v4410_v20 = vpop.f32.mrb[27].mxu1  ;;  %v806_v60 = vpop.f32.mrb[27].mxu0  ;;  %3002 = vmatprep.subr.bf16.mxu0 %v4806_v33  ;;  %3106 = vmatprep.subr.bf16.mxu1 %v4806_v33 }
 0x339   :  { %4823 = vst [vmem:[#allocation24_spill] sm:$0xff] %v4410_v20  ;;  %v3003_v27 = vpack.c.bf16 %v2818_v29, %v806_v60 }
 0x33b   :  { %v4418_v2 = vpop.f32.mrb[28].mxu1  ;;  %v2821_v13 = vpop.f32.mrb[28].mxu0  ;;  %3004 = vmatpush1.bf16.msra.mxu0 %v3003_v27  ;;  %3122 = vmatpush1.bf16.msra.mxu1 %v3003_v27 }
 0x33c   :  { %4824 = vst [vmem:[#allocation25_spill] sm:$0xff] %v4418_v2  ;;  %v4420_v40 = vpop.f32.mrb[29].mxu1  ;;  %v816_v54 = vpop.f32.mrb[29].mxu0  ;;  %3005 = vmatprep.subr.bf16.mxu0 %v4806_v33  ;;  %3107 = vmatprep.subr.bf16.mxu1 %v4806_v33 }
 0x33d   :  { %4825 = vst [vmem:[#allocation26_spill] sm:$0xff] %v4420_v40  ;;  %v3006_v20 = vpack.c.bf16 %v2821_v13, %v816_v54  ;;  %v4430_v40 = vpop.xlane.xlu1 %1019  ;;  %v4432_v2 = vpop.xlane.xlu0 %1017 }
 0x33f   :  { %v4424_v4 = vpop.f32.mrb[30].mxu1  ;;  %v2824_v60 = vpop.f32.mrb[30].mxu0  ;;  %3007 = vmatpush1.bf16.msra.mxu0 %v3006_v20  ;;  %3123 = vmatpush1.bf16.msra.mxu1 %v3006_v20 }
 0x340   :  { %4826 = vst [vmem:[#allocation27_spill] sm:$0xff] %v4424_v4  ;;  %v4426_v29 = vpop.f32.mrb[31].mxu1  ;;  %v826_v1 = vpop.f32.mrb[31].mxu0  ;;  %3008 = vmatprep.subr.bf16.mxu0 %v4806_v33  ;;  %3108 = vmatprep.subr.bf16.mxu1 %v4806_v33  ;;  %v1074_v4 = vld [vmem:[#allocation2] sm:$0xff] }
 0x341   :  { %4827 = vst [vmem:[#allocation28_spill] sm:$0xff] %v4426_v29  ;;  %v3009_v27 = vpack.c.bf16 %v2824_v60, %v826_v1  ;;  %v1043_v1 = vsel %vm1041_vm5, %v4264_v21, %v4262_v18  ;;  %v1138_v60 = vld [vmem:[#allocation2 + $0x200] sm:$0xff]  ;;  %v4447_v0 = vpop.xlane.xlu0 %924  ;;  %v1044_v18 = vsel %vm1041_vm5, %v4268_v24, %v4272_v37  ;;  %v1046_v24 = vsel %vm1041_vm5, %v4276_v48, %v4280_v45 }
 0x342   :  { %v1142_v21 = vld [vmem:[#allocation2 + $0x220] sm:$0xff]  ;;  %v1049_v48 = vsel %vm1041_vm5, %v4282_v46, %v4286_v30  ;;  %v1091_v46 = vld [vmem:[#allocation2 + $0x88] sm:$0xff]  ;;  %v1050_v30 = vsel %vm1041_vm5, %v4292_v39, %v4296_v42  ;;  %v1052_v39 = vsel %vm1041_vm5, %v4300_v44, %v4304_v52  ;;  %v1055_v44 = vsel %vm1041_vm5, %v4306_v53, %v4310_v57 }
 0x343   :  { %v4434_v25 = vpop.f32.mrb[32].mxu1  ;;  %v2827_v13 = vpop.f32.mrb[32].mxu0  ;;  %3010 = vmatpush1.bf16.msra.mxu0 %v3009_v27  ;;  %3124 = vmatpush1.bf16.msra.mxu1 %v3009_v27  ;;  %v3015_v27 = vpack.c.bf16 %v1043_v1, %v4260_v8  ;;  %v1147_v8 = vld [vmem:[#allocation2 + $0x248] sm:$0xff]  ;;  %v1150_v45 = vld [vmem:[#allocation2 + $0x260] sm:$0xff]  ;;  %v1056_v57 = vsel %vm1041_vm5, %v4320_v12, %v4336_v56  ;;  %v1058_v12 = vsel %vm1041_vm5, %v4352_v6, %v4368_v58 }
 0x344   :  { %4828 = vst [vmem:[#allocation29_spill] sm:$0xff] %v4434_v25  ;;  %v4436_v54 = vpop.f32.mrb[33].mxu1  ;;  %v836_v20 = vpop.f32.mrb[33].mxu0  ;;  %3011 = vmatprep.subr.bf16.mxu0 %v4806_v33  ;;  %3109 = vmatprep.subr.bf16.mxu1 %v4806_v33  ;;  %v1143_v25 = vld [vmem:[#allocation2 + $0x228] sm:$0xff]  ;;  %v1162_v52 = vld [vmem:[#allocation2 + $0x2c0] sm:$0xff]  ;;  %v1061_v6 = vsel %vm1041_vm5, %v4382_v63, %v4398_v5  ;;  %v1063_v63 = vsel %vm1041_vm5, %v4414_v36, %v4430_v40 }
 0x345   :  { %4829 = vst [vmem:[#allocation30_spill] sm:$0xff] %v4436_v54  ;;  %v3012_v29 = vpack.c.bf16 %v2827_v13, %v836_v20  ;;  %v4445_v54 = vpop.xlane.xlu1 %926  ;;  %v1045_v13 = vsel %vm1041_vm5, %v4266_v23, %v4270_v35  ;;  %v1083_v1 = vld [vmem:[#allocation2 + $0x48] sm:$0xff]  ;;  %v1047_v23 = vsel %vm1041_vm5, %v4274_v38, %v4278_v50  ;;  %v4464_v37 = vpop.xlane.xlu0 %1021  ;;  %v1048_v50 = vsel %vm1041_vm5, %v4284_v28, %v4288_v31  ;;  %v1154_v31 = vld [vmem:[#allocation2 + $0x280] sm:$0xff] }
 0x346   :  { %v3018_v20 = vpack.c.bf16 %v1045_v13, %v1044_v18  ;;  %v1087_v38 = vld [vmem:[#allocation2 + $0x68] sm:$0xff]  ;;  %v3024_v18 = vpack.c.bf16 %v1049_v48, %v1048_v50  ;;  %v1051_v28 = vsel %vm1041_vm5, %v4290_v34, %v4294_v41  ;;  %v1053_v34 = vsel %vm1041_vm5, %v4298_v43, %v4302_v49  ;;  %v1174_v58 = vld [vmem:[#allocation2 + $0x320] sm:$0xff] }
 0x347   :  { %3013 = vmatpush1.bf16.msra.mxu0 %v3012_v29  ;;  %3125 = vmatpush1.bf16.msra.mxu1 %v3012_v29  ;;  %v1078_v29 = vld [vmem:[#allocation2 + $0x20] sm:$0xff]  ;;  %v1155_v13 = vld [vmem:[#allocation2 + $0x288] sm:$0xff]  ;;  %v1054_v49 = vsel %vm1041_vm5, %v4308_v55, %v4312_v59  ;;  %v1057_v55 = vsel %vm1041_vm5, %v4318_v3, %v4334_v61  ;;  %v1059_v3 = vsel %vm1041_vm5, %v4350_v17, %v4366_v7 }
 0x348   :  { %3014 = vmatprep.subr.bf16.mxu1 %v4806_v33  ;;  %v1099_v43 = vld [vmem:[#allocation2 + $0xc8] sm:$0xff]  ;;  %v3033_v48 = vpack.c.bf16 %v1055_v44, %v1054_v49  ;;  %v1166_v59 = vld [vmem:[#allocation2 + $0x2e0] sm:$0xff]  ;;  %v1060_v7 = vsel %vm1041_vm5, %v4384_v11, %v4400_v19  ;;  %v1062_v11 = vsel %vm1041_vm5, %v4416_v26, %v4432_v2  ;;  %v1064_v2 = vsel %vm1041_vm5, %v4447_v0, %v4464_v37 }
 0x349   :  { %v4462_v35 = vpop.xlane.xlu1 %1023  ;;  %v1103_v53 = vld [vmem:[#allocation2 + $0xe8] sm:$0xff]  ;;  %v1178_v19 = vld [vmem:[#allocation2 + $0x340] sm:$0xff] }
 0x34a   :  { %1347 = vmatmul.mubr.f32.vlgmr.msra.gmra.mrb[34].mxu1 %v1138_v60  ;;  %1267 = vmatmul.mubr.f32.vlgmr.msra.gmra.mrb[34].mxu0 %v1074_v4  ;;  %v1151_v4 = vld [vmem:[#allocation2 + $0x268] sm:$0xff]  ;;  %v3021_v60 = vpack.c.bf16 %v1047_v23, %v1046_v24  ;;  %v1158_v24 = vld [vmem:[#allocation2 + $0x2a0] sm:$0xff]  ;;  %v1065_v36 = vsel %vm1041_vm5, %v4445_v54, %v4462_v35 }
 0x34b   :  { %3016 = vmatpush1.bf16.msra.mxu1 %v3015_v27  ;;  %1351 = vmatprep.mubr.f32.mxu1 %v1143_v25  ;;  %v1146_v25 = vld [vmem:[#allocation2 + $0x240] sm:$0xff]  ;;  %v1095_v23 = vld [vmem:[#allocation2 + $0xa8] sm:$0xff] }
 0x34c   :  { %3017 = vmatprep.subr.bf16.mxu1 %v4806_v33  ;;  %1271 = vmatprep.mubr.f32.mxu0 %v1079_v47  ;;  %v1082_v47 = vld [vmem:[#allocation2 + $0x40] sm:$0xff]  ;;  %v1111_v17 = vld [vmem:[#allocation2 + $0x128] sm:$0xff] }
 0x34d   :  { %v1086_v27 = vld [vmem:[#allocation2 + $0x60] sm:$0xff]  ;;  %v1187_v49 = vld [vmem:[#allocation2 + $0x388] sm:$0xff] }
 0x34e   :  { %1352 = vmatmul.mubr.f32.gmra.mrb[36].mxu1 %v1142_v21  ;;  %1272 = vmatmul.mubr.f32.gmra.mrb[36].mxu0 %v1078_v29  ;;  %v4474_v21 = vpop.xlane.xlu1 %930  ;;  %v4476_v29 = vpop.xlane.xlu0 %928  ;;  %v1114_v5 = vld [vmem:[#allocation2 + $0x140] sm:$0xff] }
 0x34f   :  { %3019 = vmatpush1.bf16.msra.mxu1 %v3018_v20  ;;  %1356 = vmatprep.mubr.f32.mxu1 %v1147_v8  ;;  %v1090_v8 = vld [vmem:[#allocation2 + $0x80] sm:$0xff]  ;;  %v1159_v20 = vld [vmem:[#allocation2 + $0x2a8] sm:$0xff] }
 0x350   :  { %3020 = vmatprep.subr.bf16.mxu1 %v4806_v33  ;;  %1276 = vmatprep.mubr.f32.mxu0 %v1083_v1  ;;  %v3027_v1 = vpack.c.bf16 %v1051_v28, %v1050_v30  ;;  %v1170_v28 = vld [vmem:[#allocation2 + $0x300] sm:$0xff] }
 0x351   :  { %v1106_v30 = vld [vmem:[#allocation2 + $0x100] sm:$0xff] }
 0x352   :  { %1357 = vmatmul.mubr.f32.gmra.mrb[38].mxu1 %v1146_v25  ;;  %1277 = vmatmul.mubr.f32.gmra.mrb[38].mxu0 %v1082_v47  ;;  %v4491_v41 = vpop.xlane.xlu1 %1027  ;;  %v4493_v42 = vpop.xlane.xlu0 %1025  ;;  %v1094_v25 = vld [vmem:[#allocation2 + $0xa0] sm:$0xff]  ;;  %v1163_v47 = vld [vmem:[#allocation2 + $0x2c8] sm:$0xff] }
 0x353   :  { %3022 = vmatpush1.bf16.msra.mxu1 %v3021_v60  ;;  %1361 = vmatprep.mubr.f32.mxu1 %v1151_v4  ;;  %v3030_v4 = vpack.c.bf16 %v1053_v34, %v1052_v39  ;;  %v1098_v60 = vld [vmem:[#allocation2 + $0xc0] sm:$0xff]  ;;  %v1067_v54 = vsel %vm1041_vm5, %v4474_v21, %v4491_v41  ;;  %v1066_v0 = vsel %vm1041_vm5, %v4476_v29, %v4493_v42 }
 0x354   :  { %3023 = vmatprep.subr.bf16.mxu1 %v4806_v33  ;;  %1281 = vmatprep.mubr.f32.mxu0 %v1087_v38  ;;  %v1167_v38 = vld [vmem:[#allocation2 + $0x2e8] sm:$0xff]  ;;  %v1118_v44 = vld [vmem:[#allocation2 + $0x160] sm:$0xff] }
 0x355   :  { %v1186_v35 = vld [vmem:[#allocation2 + $0x380] sm:$0xff] }
 0x356   :  { %1362 = vmatmul.mubr.f32.gmra.mrb[40].mxu1 %v1150_v45  ;;  %1282 = vmatmul.mubr.f32.gmra.mrb[40].mxu0 %v1086_v27  ;;  %v4503_v50 = vpop.xlane.xlu1 %934  ;;  %v4505_v45 = vpop.xlane.xlu0 %932  ;;  %v1102_v27 = vld [vmem:[#allocation2 + $0xe0] sm:$0xff] }
 0x357   :  { %3025 = vmatpush1.bf16.msra.mxu1 %v3024_v18  ;;  %1366 = vmatprep.mubr.f32.mxu1 %v1155_v13  ;;  %v1171_v13 = vld [vmem:[#allocation2 + $0x308] sm:$0xff]  ;;  %v3036_v18 = vpack.c.bf16 %v1057_v55, %v1056_v57  ;;  %v1122_v37 = vld [vmem:[#allocation2 + $0x180] sm:$0xff] }
 0x358   :  { %3026 = vmatprep.subr.bf16.mxu1 %v4806_v33  ;;  %1286 = vmatprep.mubr.f32.mxu0 %v1091_v46  ;;  %v1107_v46 = vld [vmem:[#allocation2 + $0x108] sm:$0xff]  ;;  %v1190_v41 = vld [vmem:[#allocation2 + $0x3a0] sm:$0xff] }
 0x359   :  { %v1127_v57 = vld [vmem:[#allocation2 + $0x1a8] sm:$0xff]  ;;  %v1126_v42 = vld [vmem:[#allocation2 + $0x1a0] sm:$0xff] }
 0x35a   :  { %1367 = vmatmul.mubr.f32.gmra.mrb[42].mxu1 %v1154_v31  ;;  %1287 = vmatmul.mubr.f32.gmra.mrb[42].mxu0 %v1090_v8  ;;  %v4520_v61 = vpop.xlane.xlu1 %1031  ;;  %v4522_v56 = vpop.xlane.xlu0 %1029  ;;  %v1175_v31 = vld [vmem:[#allocation2 + $0x328] sm:$0xff]  ;;  %v3039_v8 = vpack.c.bf16 %v1059_v3, %v1058_v12  ;;  %v1194_v3 = vld [vmem:[#allocation2 + $0x3c0] sm:$0xff] }
 0x35b   :  { %3028 = vmatpush1.bf16.msra.mxu1 %v3027_v1  ;;  %1371 = vmatprep.mubr.f32.mxu1 %v1159_v20  ;;  %v1110_v20 = vld [vmem:[#allocation2 + $0x120] sm:$0xff]  ;;  %v1179_v1 = vld [vmem:[#allocation2 + $0x348] sm:$0xff]  ;;  %v1069_v21 = vsel %vm1041_vm5, %v4503_v50, %v4520_v61  ;;  %v1068_v29 = vsel %vm1041_vm5, %v4505_v45, %v4522_v56 }
 0x35c   :  { %3029 = vmatprep.subr.bf16.mxu1 %v4806_v33  ;;  %1291 = vmatprep.mubr.f32.mxu0 %v1095_v23  ;;  %v3042_v23 = vpack.c.bf16 %v1061_v6, %v1060_v7  ;;  %v1130_v12 = vld [vmem:[#allocation2 + $0x1c0] sm:$0xff]  ;;  %v1199_v61 = vld [vmem:[#allocation2 + $0x3e8] sm:$0xff]  ;;  %v1077_v6 = vld [vmem:[#allocation2 + $0x18] sm:$0xff] }
 0x35e   :  { %1372 = vmatmul.mubr.f32.gmra.mrb[44].mxu1 %v1158_v24  ;;  %1292 = vmatmul.mubr.f32.gmra.mrb[44].mxu0 %v1094_v25  ;;  %v939_v34 = vpop.xlane.xlu1 %938  ;;  %v937_v39 = vpop.xlane.xlu0 %936  ;;  %v1115_v24 = vld [vmem:[#allocation2 + $0x148] sm:$0xff] }
 0x35f   :  { %3031 = vmatpush1.bf16.msra.mxu1 %v3030_v4  ;;  %1376 = vmatprep.mubr.f32.mxu1 %v1163_v47  ;;  %v1183_v25 = vld [vmem:[#allocation2 + $0x368] sm:$0xff]  ;;  %v3045_v47 = vpack.c.bf16 %v1063_v63, %v1062_v11  ;;  %v1092_v63 = vld [vmem:[#allocation2 + $0x90] sm:$0xff]  ;;  %v1097_v11 = vld [vmem:[#allocation2 + $0xb8] sm:$0xff] }
 0x360   :  { %3032 = vmatprep.subr.bf16.mxu1 %v4806_v33  ;;  %1296 = vmatprep.mubr.f32.mxu0 %v1099_v43  ;;  %v1119_v4 = vld [vmem:[#allocation2 + $0x168] sm:$0xff]  ;;  %v1182_v43 = vld [vmem:[#allocation2 + $0x360] sm:$0xff] }
 0x362   :  { %1377 = vmatmul.mubr.f32.gmra.mrb[46].mxu1 %v1162_v52  ;;  %1297 = vmatmul.mubr.f32.gmra.mrb[46].mxu0 %v1098_v60  ;;  %v1036_v26 = vpop.xlane.xlu1 %1035  ;;  %v1034_v40 = vpop.xlane.xlu0 %1033  ;;  %v3048_v52 = vpack.c.bf16 %v1065_v36, %v1064_v2  ;;  %v1123_v60 = vld [vmem:[#allocation2 + $0x188] sm:$0xff]  ;;  %v1109_v36 = vld [vmem:[#allocation2 + $0x118] sm:$0xff]  ;;  %v1108_v2 = vld [vmem:[#allocation2 + $0x110] sm:$0xff] }
 0x363   :  { %3034 = vmatpush1.bf16.msra.mxu1 %v3033_v48  ;;  %1381 = vmatprep.mubr.f32.mxu1 %v1167_v38  ;;  %v1191_v38 = vld [vmem:[#allocation2 + $0x3a8] sm:$0xff]  ;;  %v3051_v48 = vpack.c.bf16 %v1067_v54, %v1066_v0  ;;  %v1070_v50 = vsel %vm1041_vm5, %v937_v39, %v1034_v40  ;;  %v1089_v39 = vld [vmem:[#allocation2 + $0x78] sm:$0xff]  ;;  %v1112_v40 = vld [vmem:[#allocation2 + $0x130] sm:$0xff] }
 0x364   :  { %3035 = vmatprep.subr.bf16.mxu1 %v4806_v33  ;;  %1301 = vmatprep.mubr.f32.mxu0 %v1103_v53  ;;  %v1124_v54 = vld [vmem:[#allocation2 + $0x190] sm:$0xff]  ;;  %v1129_v0 = vld [vmem:[#allocation2 + $0x1b8] sm:$0xff] }
 0x366   :  { %1382 = vmatmul.mubr.f32.gmra.mrb[48].mxu1 %v1166_v59  ;;  %1302 = vmatmul.mubr.f32.gmra.mrb[48].mxu0 %v1102_v27  ;;  %v943_v53 = vpop.xlane.xlu1 %942  ;;  %v941_v55 = vpop.xlane.xlu0 %940  ;;  %v1195_v59 = vld [vmem:[#allocation2 + $0x3c8] sm:$0xff]  ;;  %v3054_v27 = vpack.c.bf16 %v1069_v21, %v1068_v29  ;;  %v1145_v21 = vld [vmem:[#allocation2 + $0x238] sm:$0xff]  ;;  %v1144_v29 = vld [vmem:[#allocation2 + $0x230] sm:$0xff] }
 0x367   :  { %3037 = vmatpush1.bf16.msra.mxu1 %v3036_v18  ;;  %1386 = vmatprep.mubr.f32.mxu1 %v1171_v13  ;;  %v1131_v13 = vld [vmem:[#allocation2 + $0x1c8] sm:$0xff]  ;;  %v1071_v18 = vsel %vm1041_vm5, %v939_v34, %v1036_v26  ;;  %v1084_v34 = vld [vmem:[#allocation2 + $0x50] sm:$0xff]  ;;  %v1113_v26 = vld [vmem:[#allocation2 + $0x138] sm:$0xff] }
 0x368   :  { %3038 = vmatprep.subr.bf16.mxu1 %v4806_v33  ;;  %1306 = vmatprep.mubr.f32.mxu0 %v1107_v46  ;;  %v3057_v56 = vpack.c.bf16 %v1071_v18, %v1070_v50  ;;  %v1156_v18 = vld [vmem:[#allocation2 + $0x290] sm:$0xff]  ;;  %v1161_v50 = vld [vmem:[#allocation2 + $0x2b8] sm:$0xff] }
 0x36a   :  { %1387 = vmatmul.mubr.f32.gmra.mrb[50].mxu1 %v1170_v28  ;;  %1307 = vmatmul.mubr.f32.gmra.mrb[50].mxu0 %v1106_v30  ;;  %v1040_v46 = vpop.xlane.xlu1 %1039  ;;  %v1038_v45 = vpop.xlane.xlu0 %1037  ;;  %v1135_v28 = vld [vmem:[#allocation2 + $0x1e8] sm:$0xff] }
 0x36b   :  { %3040 = vmatpush1.bf16.msra.mxu1 %v3039_v8  ;;  %1391 = vmatprep.mubr.f32.mxu1 %v1175_v31  ;;  %v1073_v30 = vsel %vm1041_vm5, %v943_v53, %v1040_v46  ;;  %v1072_v31 = vsel %vm1041_vm5, %v941_v55, %v1038_v45  ;;  %v1198_v8 = vld [vmem:[#allocation2 + $0x3e0] sm:$0xff]  ;;  %v1136_v53 = vld [vmem:[#allocation2 + $0x1f0] sm:$0xff]  ;;  %v1141_v55 = vld [vmem:[#allocation2 + $0x218] sm:$0xff] }
 0x36c   :  { %3041 = vmatprep.subr.bf16.mxu1 %v4806_v33  ;;  %1311 = vmatprep.mubr.f32.mxu0 %v1111_v17  ;;  %v1134_v17 = vld [vmem:[#allocation2 + $0x1e0] sm:$0xff]  ;;  %v3060_v7 = vpack.c.bf16 %v1073_v30, %v1072_v31  ;;  %v1160_v46 = vld [vmem:[#allocation2 + $0x2b0] sm:$0xff]  ;;  %v1165_v45 = vld [vmem:[#allocation2 + $0x2d8] sm:$0xff] }
 0x36d   :  { %v1177_v30 = vld [vmem:[#allocation2 + $0x338] sm:$0xff]  ;;  %v1176_v31 = vld [vmem:[#allocation2 + $0x330] sm:$0xff] }
 0x36e   :  { %1392 = vmatmul.mubr.f32.gmra.mrb[52].mxu1 %v1174_v58  ;;  %1312 = vmatmul.mubr.f32.gmra.mrb[52].mxu0 %v1110_v20  ;;  %v1076_v58 = vld [vmem:[#allocation2 + $0x10] sm:$0xff]  ;;  %v1081_v20 = vld [vmem:[#allocation2 + $0x38] sm:$0xff] }
 0x36f   :  { %3043 = vmatpush1.bf16.msra.mxu1 %v3042_v23  ;;  %1396 = vmatprep.mubr.f32.mxu1 %v1179_v1  ;;  %v1080_v1 = vld [vmem:[#allocation2 + $0x30] sm:$0xff]  ;;  %v1085_v23 = vld [vmem:[#allocation2 + $0x58] sm:$0xff] }
 0x370   :  { %3044 = vmatprep.subr.bf16.mxu1 %v4806_v33  ;;  %1316 = vmatprep.mubr.f32.mxu0 %v1115_v24  ;;  %v1093_v24 = vld [vmem:[#allocation2 + $0x98] sm:$0xff] }
 0x372   :  { %1397 = vmatmul.mubr.f32.gmra.mrb[54].mxu1 %v1178_v19  ;;  %1317 = vmatmul.mubr.f32.gmra.mrb[54].mxu0 %v1114_v5  ;;  %v1096_v19 = vld [vmem:[#allocation2 + $0xb0] sm:$0xff]  ;;  %v1101_v5 = vld [vmem:[#allocation2 + $0xd8] sm:$0xff] }
 0x373   :  { %3046 = vmatpush1.bf16.msra.mxu1 %v3045_v47  ;;  %1401 = vmatprep.mubr.f32.mxu1 %v1183_v25  ;;  %v1100_v25 = vld [vmem:[#allocation2 + $0xd0] sm:$0xff]  ;;  %v1105_v47 = vld [vmem:[#allocation2 + $0xf8] sm:$0xff] }
 0x374   :  { %3047 = vmatprep.subr.bf16.mxu1 %v4806_v33  ;;  %1321 = vmatprep.mubr.f32.mxu0 %v1119_v4  ;;  %v1104_v4 = vld [vmem:[#allocation2 + $0xf0] sm:$0xff] }
 0x376   :  { %1402 = vmatmul.mubr.f32.gmra.mrb[56].mxu1 %v1182_v43  ;;  %1322 = vmatmul.mubr.f32.gmra.mrb[56].mxu0 %v1118_v44  ;;  %v1117_v43 = vld [vmem:[#allocation2 + $0x158] sm:$0xff]  ;;  %v1116_v44 = vld [vmem:[#allocation2 + $0x150] sm:$0xff] }
 0x377   :  { %3049 = vmatpush1.bf16.msra.mxu1 %v3048_v52  ;;  %1406 = vmatprep.mubr.f32.mxu1 %v1187_v49  ;;  %v1121_v49 = vld [vmem:[#allocation2 + $0x178] sm:$0xff]  ;;  %v1120_v52 = vld [vmem:[#allocation2 + $0x170] sm:$0xff] }
 0x378   :  { %3050 = vmatprep.subr.bf16.mxu1 %v4806_v33  ;;  %1326 = vmatprep.mubr.f32.mxu0 %v1123_v60  ;;  %v1125_v60 = vld [vmem:[#allocation2 + $0x198] sm:$0xff] }
 0x37a   :  { %1407 = vmatmul.mubr.f32.gmra.mrb[58].mxu1 %v1186_v35  ;;  %1327 = vmatmul.mubr.f32.gmra.mrb[58].mxu0 %v1122_v37  ;;  %v1128_v35 = vld [vmem:[#allocation2 + $0x1b0] sm:$0xff]  ;;  %v1133_v37 = vld [vmem:[#allocation2 + $0x1d8] sm:$0xff] }
 0x37b   :  { %3052 = vmatpush1.bf16.msra.mxu1 %v3051_v48  ;;  %1411 = vmatprep.mubr.f32.mxu1 %v1191_v38  ;;  %v1132_v38 = vld [vmem:[#allocation2 + $0x1d0] sm:$0xff]  ;;  %v1137_v48 = vld [vmem:[#allocation2 + $0x1f8] sm:$0xff] }
 0x37c   :  { %3053 = vmatprep.subr.bf16.mxu1 %v4806_v33  ;;  %1331 = vmatprep.mubr.f32.mxu0 %v1127_v57  ;;  %v1140_v57 = vld [vmem:[#allocation2 + $0x210] sm:$0xff] }
 0x37e   :  { %1412 = vmatmul.mubr.f32.gmra.mrb[60].mxu1 %v1190_v41  ;;  %1332 = vmatmul.mubr.f32.gmra.mrb[60].mxu0 %v1126_v42  ;;  %v1149_v41 = vld [vmem:[#allocation2 + $0x258] sm:$0xff]  ;;  %v1148_v42 = vld [vmem:[#allocation2 + $0x250] sm:$0xff] }
 0x37f   :  { %3055 = vmatpush1.bf16.msra.mxu1 %v3054_v27  ;;  %1416 = vmatprep.mubr.f32.mxu1 %v1195_v59  ;;  %v1153_v59 = vld [vmem:[#allocation2 + $0x278] sm:$0xff]  ;;  %v1152_v27 = vld [vmem:[#allocation2 + $0x270] sm:$0xff] }
 0x380   :  { %3056 = vmatprep.subr.bf16.mxu1 %v4806_v33  ;;  %1336 = vmatprep.mubr.f32.mxu0 %v1131_v13  ;;  %v1157_v13 = vld [vmem:[#allocation2 + $0x298] sm:$0xff] }
 0x382   :  { %1417 = vmatmul.mubr.f32.gmra.mrb[62].mxu1 %v1194_v3  ;;  %1337 = vmatmul.mubr.f32.gmra.mrb[62].mxu0 %v1130_v12  ;;  %v1164_v3 = vld [vmem:[#allocation2 + $0x2d0] sm:$0xff]  ;;  %v1169_v12 = vld [vmem:[#allocation2 + $0x2f8] sm:$0xff] }
 0x383   :  { %3058 = vmatpush1.bf16.msra.mxu1 %v3057_v56  ;;  %1421 = vmatprep.mubr.f32.mxu1 %v1199_v61  ;;  %v1168_v61 = vld [vmem:[#allocation2 + $0x2f0] sm:$0xff]  ;;  %v1173_v56 = vld [vmem:[#allocation2 + $0x318] sm:$0xff] }
 0x384   :  { %3059 = vmatprep.subr.bf16.mxu1 %v4806_v33  ;;  %1341 = vmatprep.mubr.f32.mxu0 %v1135_v28  ;;  %v1088_v33 = vld [vmem:[#allocation2 + $0x70] sm:$0xff] }
 0x385   :  { %v1172_v28 = vld [vmem:[#allocation2 + $0x310] sm:$0xff] }
 0x386   :  { %1422 = vmatmul.mubr.f32.gmra.mrb[64].mxu1 %v1198_v8  ;;  %1342 = vmatmul.mubr.f32.gmra.mrb[64].mxu0 %v1134_v17  ;;  %v1181_v8 = vld [vmem:[#allocation2 + $0x358] sm:$0xff]  ;;  %v1180_v17 = vld [vmem:[#allocation2 + $0x350] sm:$0xff] }
 0x387   :  { %3061 = vmatpush1.bf16.msra.mxu1 %v3060_v7  ;;  %1491 = vmatprep.mubr.f32.mxu1 %v1077_v6  ;;  %v1185_v6 = vld [vmem:[#allocation2 + $0x378] sm:$0xff]  ;;  %v1184_v7 = vld [vmem:[#allocation2 + $0x370] sm:$0xff] }
 0x38a   :  { %1492 = vmatmul.mubr.f32.vlgmr.msra.gmra.mrb[66].mxu1 %v1076_v58  ;;  %v1189_v58 = vld [vmem:[#allocation2 + $0x398] sm:$0xff] }
 0x38b   :  { %1496 = vmatprep.mubr.f32.mxu1 %v1081_v20  ;;  %v1188_v20 = vld [vmem:[#allocation2 + $0x390] sm:$0xff] }
 0x38e   :  { %1497 = vmatmul.mubr.f32.gmra.mrb[68].mxu1 %v1080_v1  ;;  %v1193_v1 = vld [vmem:[#allocation2 + $0x3b8] sm:$0xff] }
 0x38f   :  { %1501 = vmatprep.mubr.f32.mxu1 %v1085_v23  ;;  %v1192_v23 = vld [vmem:[#allocation2 + $0x3b0] sm:$0xff] }
 0x392   :  { %1502 = vmatmul.mubr.f32.gmra.mrb[70].mxu1 %v1084_v34  ;;  %v1197_v34 = vld [vmem:[#allocation2 + $0x3d8] sm:$0xff] }
 0x393   :  { %1506 = vmatprep.mubr.f32.mxu1 %v1089_v39  ;;  %v1196_v39 = vld [vmem:[#allocation2 + $0x3d0] sm:$0xff] }
 0x396   :  { %1507 = vmatmul.mubr.f32.gmra.mrb[72].mxu1 %v1088_v33  ;;  %v1201_v33 = vld [vmem:[#allocation2 + $0x3f8] sm:$0xff] }
 0x397   :  { %1511 = vmatprep.mubr.f32.mxu1 %v1093_v24  ;;  %v1200_v24 = vld [vmem:[#allocation2 + $0x3f0] sm:$0xff] }
 0x39a   :  { %1512 = vmatmul.mubr.f32.gmra.mrb[74].mxu1 %v1092_v63  ;;  %v1812_v63 = vld [vmem:[%s4797_s5] sm:$0x3] }
 0x39b   :  { %1516 = vmatprep.mubr.f32.mxu1 %v1097_v11  ;;  %2828 = vmatprep.subr.msk.mxu0 %vm1910_vm6, %v1812_v63 }
 0x39c   :  { %2829 = vmatpush3.msk.msra.mxu0 %vm1910_vm6, %v1812_v63 }
 0x39e   :  { %1517 = vmatmul.mubr.f32.gmra.mrb[76].mxu1 %v1096_v19 }
 0x39f   :  { %1521 = vmatprep.mubr.f32.mxu1 %v1101_v5 }
 0x3a2   :  { %1522 = vmatmul.mubr.f32.gmra.mrb[78].mxu1 %v1100_v25 }
 0x3a3   :  { %1526 = vmatprep.mubr.f32.mxu1 %v1105_v47 }
 0x3a6   :  { %1527 = vmatmul.mubr.f32.gmra.mrb[80].mxu1 %v1104_v4 }
 0x3a7   :  { %1531 = vmatprep.mubr.f32.mxu1 %v1109_v36 }
 0x3aa   :  { %1532 = vmatmul.mubr.f32.gmra.mrb[82].mxu1 %v1108_v2 }
 0x3ab   :  { %1536 = vmatprep.mubr.f32.mxu1 %v1113_v26 }
 0x3ae   :  { %1537 = vmatmul.mubr.f32.gmra.mrb[84].mxu1 %v1112_v40 }
 0x3af   :  { %1541 = vmatprep.mubr.f32.mxu1 %v1117_v43 }
 0x3b2   :  { %1542 = vmatmul.mubr.f32.gmra.mrb[86].mxu1 %v1116_v44 }
 0x3b3   :  { %1546 = vmatprep.mubr.f32.mxu1 %v1121_v49 }
 0x3b6   :  { %1547 = vmatmul.mubr.f32.gmra.mrb[88].mxu1 %v1120_v52 }
 0x3b7   :  { %1551 = vmatprep.mubr.f32.mxu1 %v1125_v60 }
 0x3ba   :  { %1552 = vmatmul.mubr.f32.gmra.mrb[90].mxu1 %v1124_v54 }
 0x3bb   :  { %1556 = vmatprep.mubr.f32.mxu1 %v1129_v0 }
 0x3be   :  { %1557 = vmatmul.mubr.f32.gmra.mrb[92].mxu1 %v1128_v35 }
 0x3bf   :  { %1561 = vmatprep.mubr.f32.mxu1 %v1133_v37 }
 0x3c2   :  { %1562 = vmatmul.mubr.f32.gmra.mrb[94].mxu1 %v1132_v38 }
 0x3c3   :  { %1566 = vmatprep.mubr.f32.mxu1 %v1137_v48 }
 0x3c6   :  { %1567 = vmatmul.mubr.f32.gmra.mrb[96].mxu1 %v1136_v53 }
 0x3c7   :  { %1571 = vmatprep.mubr.f32.mxu1 %v1141_v55 }
 0x3ca   :  { %1572 = vmatmul.mubr.f32.gmra.mrb[34].mxu1 %v1140_v57 }
 0x3cb   :  { %1576 = vmatprep.mubr.f32.mxu1 %v1145_v21 }
 0x3ce   :  { %1577 = vmatmul.mubr.f32.gmra.mrb[36].mxu1 %v1144_v29 }
 0x3cf   :  { %1581 = vmatprep.mubr.f32.mxu1 %v1149_v41 }
 0x3d2   :  { %1582 = vmatmul.mubr.f32.gmra.mrb[38].mxu1 %v1148_v42 }
 0x3d3   :  { %1586 = vmatprep.mubr.f32.mxu1 %v1153_v59 }
 0x3d6   :  { %1587 = vmatmul.mubr.f32.gmra.mrb[40].mxu1 %v1152_v27 }
 0x3d7   :  { %1591 = vmatprep.mubr.f32.mxu1 %v1157_v13 }
 0x3da   :  { %1592 = vmatmul.mubr.f32.gmra.mrb[42].mxu1 %v1156_v18 }
 0x3db   :  { %1596 = vmatprep.mubr.f32.mxu1 %v1161_v50 }
 0x3de   :  { %1597 = vmatmul.mubr.f32.gmra.mrb[44].mxu1 %v1160_v46 }
 0x3df   :  { %1601 = vmatprep.mubr.f32.mxu1 %v1165_v45 }
 0x3e2   :  { %1602 = vmatmul.mubr.f32.gmra.mrb[46].mxu1 %v1164_v3 }
 0x3e3   :  { %1606 = vmatprep.mubr.f32.mxu1 %v1169_v12 }
 0x3e6   :  { %1607 = vmatmul.mubr.f32.gmra.mrb[48].mxu1 %v1168_v61 }
 0x3e7   :  { %1611 = vmatprep.mubr.f32.mxu1 %v1173_v56 }
 0x3ea   :  { %1612 = vmatmul.mubr.f32.gmra.mrb[50].mxu1 %v1172_v28 }
 0x3eb   :  { %1616 = vmatprep.mubr.f32.mxu1 %v1177_v30 }
 0x3ee   :  { %1617 = vmatmul.mubr.f32.gmra.mrb[52].mxu1 %v1176_v31 }
 0x3ef   :  { %1621 = vmatprep.mubr.f32.mxu1 %v1181_v8 }
 0x3f2   :  { %1622 = vmatmul.mubr.f32.gmra.mrb[54].mxu1 %v1180_v17 }
 0x3f3   :  { %1626 = vmatprep.mubr.f32.mxu1 %v1185_v6 }
 0x3f6   :  { %1627 = vmatmul.mubr.f32.gmra.mrb[56].mxu1 %v1184_v7 }
 0x3f7   :  { %1631 = vmatprep.mubr.f32.mxu1 %v1189_v58 }
 0x3fa   :  { %1632 = vmatmul.mubr.f32.gmra.mrb[58].mxu1 %v1188_v20 }
 0x3fb   :  { %1636 = vmatprep.mubr.f32.mxu1 %v1193_v1 }
 0x3fe   :  { %1637 = vmatmul.mubr.f32.gmra.mrb[60].mxu1 %v1192_v23 }
 0x3ff   :  { %1641 = vmatprep.mubr.f32.mxu1 %v1197_v34 }
 0x402   :  { %1642 = vmatmul.mubr.f32.gmra.mrb[62].mxu1 %v1196_v39 }
 0x403   :  { %1646 = vmatprep.mubr.f32.mxu1 %v1201_v33 }
 0x406   :  { %1647 = vmatmul.mubr.f32.gmra.mrb[64].mxu1 %v1200_v24 }
 0x41d   :  { %v1268_v11 = vpop.f32.mrb[34].mxu0 }
 0x41e   :  { %v1270_v19 = vpop.f32.mrb[35].mxu0 }
 0x421   :  { %v1273_v5 = vpop.f32.mrb[36].mxu0 }
 0x422   :  { %v1275_v25 = vpop.f32.mrb[37].mxu0 }
 0x425   :  { %v1278_v47 = vpop.f32.mrb[38].mxu0 }
 0x426   :  { %v1280_v4 = vpop.f32.mrb[39].mxu0 }
 0x429   :  { %v1283_v36 = vpop.f32.mrb[40].mxu0 }
 0x42a   :  { %v1285_v2 = vpop.f32.mrb[41].mxu0 }
 0x42d   :  { %v1288_v26 = vpop.f32.mrb[42].mxu0 }
 0x42e   :  { %v1290_v40 = vpop.f32.mrb[43].mxu0 }
 0x431   :  { %v1293_v43 = vpop.f32.mrb[44].mxu0 }
 0x432   :  { %v1295_v44 = vpop.f32.mrb[45].mxu0 }
 0x435   :  { %v4569_v49 = vpop.f32.mrb[46].mxu0 }
 0x436   :  { %v1300_v52 = vpop.f32.mrb[47].mxu0 }
 0x439   :  { %v4571_v60 = vpop.f32.mrb[48].mxu0 }
 0x43a   :  { %v1305_v54 = vpop.f32.mrb[49].mxu0 }
 0x43d   :  { %v4573_v0 = vpop.f32.mrb[50].mxu0 }
 0x43e   :  { %v1310_v35 = vpop.f32.mrb[51].mxu0 }
 0x441   :  { %v4575_v37 = vpop.f32.mrb[52].mxu0 }
 0x442   :  { %v1315_v38 = vpop.f32.mrb[53].mxu0 }
 0x445   :  { %v4577_v48 = vpop.f32.mrb[54].mxu0 }
 0x446   :  { %v1320_v53 = vpop.f32.mrb[55].mxu0 }
 0x449   :  { %v4579_v55 = vpop.f32.mrb[56].mxu0 }
 0x44a   :  { %v1325_v57 = vpop.f32.mrb[57].mxu0 }
 0x44d   :  { %v4581_v21 = vpop.f32.mrb[58].mxu0 }
 0x44e   :  { %v1330_v29 = vpop.f32.mrb[59].mxu0 }
 0x451   :  { %v4583_v41 = vpop.f32.mrb[60].mxu0 }
 0x452   :  { %v1335_v42 = vpop.f32.mrb[61].mxu0 }
 0x455   :  { %v4585_v59 = vpop.f32.mrb[62].mxu0 }
 0x456   :  { %v1340_v27 = vpop.f32.mrb[63].mxu0 }
 0x459   :  { %v4587_v13 = vpop.f32.mrb[64].mxu0 }
 0x45a   :  { %v1345_v18 = vpop.f32.mrb[65].mxu0 }
 0x45d   :  { %v1493_v50 = vpop.f32.mrb[66].mxu1 }
 0x45e   :  { %v1494_v46 = vadd.f32 %v1493_v50, %v1268_v11  ;;  %v1495_v45 = vpop.f32.mrb[67].mxu1 }
 0x460   :  { %v1652_v3 = vsub.f32 0.0, %v1494_v46 }
 0x461   :  { %v1498_v12 = vpop.f32.mrb[68].mxu1 }
 0x462   :  { %v1684_v61 = vmul.f32 1.442695, %v1652_v3  ;;  %v1499_v56 = vadd.f32 %v1498_v12, %v1273_v5  ;;  %v1500_v28 = vpop.f32.mrb[69].mxu1 }
 0x464   :  { %3187 = vpow2.f32 %v1684_v61  ;;  %v1653_v30 = vsub.f32 0.0, %v1499_v56 }
 0x465   :  { %v1503_v31 = vpop.f32.mrb[70].mxu1 }
 0x466   :  { %v1686_v8 = vmul.f32 1.442695, %v1653_v30  ;;  %v1504_v17 = vadd.f32 %v1503_v31, %v1278_v47  ;;  %v1505_v6 = vpop.f32.mrb[71].mxu1 }
 0x468   :  { %3189 = vpow2.f32 %v1686_v8  ;;  %v1654_v7 = vsub.f32 0.0, %v1504_v17 }
 0x469   :  { %v1508_v58 = vpop.f32.mrb[72].mxu1 }
 0x46a   :  { %v1688_v20 = vmul.f32 1.442695, %v1654_v7  ;;  %v1509_v1 = vadd.f32 %v1508_v58, %v1283_v36  ;;  %v1510_v23 = vpop.f32.mrb[73].mxu1 }
 0x46c   :  { %3191 = vpow2.f32 %v1688_v20  ;;  %v1655_v34 = vsub.f32 0.0, %v1509_v1 }
 0x46d   :  { %v1513_v39 = vpop.f32.mrb[74].mxu1 }
 0x46e   :  { %v3188_v33 = vpop.eup %3187  ;;  %v1690_v24 = vmul.f32 1.442695, %v1655_v34  ;;  %v1514_v63 = vadd.f32 %v1513_v39, %v1288_v26  ;;  %v1515_v11 = vpop.f32.mrb[75].mxu1 }
 0x46f   :  { %v1748_v19 = vadd.f32 1.0, %v3188_v33 }
 0x470   :  { %3193 = vpow2.f32 %v1690_v24  ;;  %v1656_v5 = vsub.f32 0.0, %v1514_v63 }
 0x471   :  { %3195 = vrcp.f32 %v1748_v19  ;;  %v1518_v25 = vpop.f32.mrb[76].mxu1 }
 0x472   :  { %v3190_v47 = vpop.eup %3189  ;;  %v1692_v4 = vmul.f32 1.442695, %v1656_v5  ;;  %v1519_v2 = vadd.f32 %v1518_v25, %v1293_v43  ;;  %v1520_v40 = vpop.f32.mrb[77].mxu1 }
 0x473   :  { %v1749_v44 = vadd.f32 1.0, %v3190_v47 }
 0x474   :  { %3197 = vpow2.f32 %v1692_v4  ;;  %v1657_v36 = vsub.f32 0.0, %v1519_v2 }
 0x475   :  { %3199 = vrcp.f32 %v1749_v44  ;;  %v1523_v52 = vpop.f32.mrb[78].mxu1 }
 0x476   :  { %v3192_v54 = vpop.eup %3191  ;;  %v1694_v35 = vmul.f32 1.442695, %v1657_v36  ;;  %v1524_v38 = vadd.f32 %v1523_v52, %v4569_v49  ;;  %v1525_v26 = vpop.f32.mrb[79].mxu1 }
 0x477   :  { %v1750_v53 = vadd.f32 1.0, %v3192_v54 }
 0x478   :  { %3201 = vpow2.f32 %v1694_v35  ;;  %v1658_v57 = vsub.f32 0.0, %v1524_v38 }
 0x479   :  { %3203 = vrcp.f32 %v1750_v53  ;;  %v1528_v29 = vpop.f32.mrb[80].mxu1 }
 0x47a   :  { %v3194_v42 = vpop.eup %3193  ;;  %v1696_v27 = vmul.f32 1.442695, %v1658_v57  ;;  %v1529_v43 = vadd.f32 %v1528_v29, %v4571_v60  ;;  %v1530_v18 = vpop.f32.mrb[81].mxu1 }
 0x47b   :  { %v3196_v50 = vpop.eup %3195  ;;  %v1751_v46 = vadd.f32 1.0, %v3194_v42 }
 0x47c   :  { %3205 = vpow2.f32 %v1696_v27  ;;  %v1659_v45 = vsub.f32 0.0, %v1529_v43  ;;  %2830 = vmatprep.mubr.msk.f32.mxu0 %vm1813_vm7, %v3196_v50 }
 0x47d   :  { %3207 = vrcp.f32 %v1751_v46  ;;  %v1533_v49 = vpop.f32.mrb[82].mxu1 }
 0x47e   :  { %v3198_v3 = vpop.eup %3197  ;;  %v1698_v12 = vmul.f32 1.442695, %v1659_v45  ;;  %v1534_v61 = vadd.f32 %v1533_v49, %v4573_v0  ;;  %v1535_v56 = vpop.f32.mrb[83].mxu1 }
 0x47f   :  { %v3200_v28 = vpop.eup %3199  ;;  %v1752_v30 = vadd.f32 1.0, %v3198_v3 }
 0x480   :  { %3209 = vpow2.f32 %v1698_v12  ;;  %v1660_v31 = vsub.f32 0.0, %v1534_v61  ;;  %2831 = vmatmul.mubr.msk.f32.vlgmr.msra.gmra.mrb[66].mxu0 %vm1813_vm7, %v3200_v28 }
 0x481   :  { %3211 = vrcp.f32 %v1752_v30  ;;  %v1538_v60 = vpop.f32.mrb[84].mxu1 }
 0x482   :  { %v3202_v8 = vpop.eup %3201  ;;  %v1700_v17 = vmul.f32 1.442695, %v1660_v31  ;;  %v1539_v6 = vadd.f32 %v1538_v60, %v4575_v37  ;;  %v1540_v7 = vpop.f32.mrb[85].mxu1 }
 0x483   :  { %v3204_v58 = vpop.eup %3203  ;;  %v1753_v20 = vadd.f32 1.0, %v3202_v8 }
 0x484   :  { %3213 = vpow2.f32 %v1700_v17  ;;  %v1661_v1 = vsub.f32 0.0, %v1539_v6  ;;  %2833 = vmatprep.mubr.msk.f32.mxu0 %vm1813_vm7, %v3204_v58 }
 0x485   :  { %3215 = vrcp.f32 %v1753_v20  ;;  %v1543_v0 = vpop.f32.mrb[86].mxu1 }
 0x486   :  { %v3206_v23 = vpop.eup %3205  ;;  %v1702_v34 = vmul.f32 1.442695, %v1661_v1  ;;  %v1544_v39 = vadd.f32 %v1543_v0, %v4577_v48  ;;  %v1545_v33 = vpop.f32.mrb[87].mxu1 }
 0x487   :  { %v3208_v24 = vpop.eup %3207  ;;  %v1754_v63 = vadd.f32 1.0, %v3206_v23 }
 0x488   :  { %3217 = vpow2.f32 %v1702_v34  ;;  %v1662_v11 = vsub.f32 0.0, %v1544_v39  ;;  %2834 = vmatmul.mubr.msk.f32.gmra.mrb[68].mxu0 %vm1813_vm7, %v3208_v24 }
 0x489   :  { %3219 = vrcp.f32 %v1754_v63  ;;  %v1548_v37 = vpop.f32.mrb[88].mxu1 }
 0x48a   :  { %v3210_v19 = vpop.eup %3209  ;;  %v1704_v5 = vmul.f32 1.442695, %v1662_v11  ;;  %v1549_v25 = vadd.f32 %v1548_v37, %v4579_v55  ;;  %v1550_v47 = vpop.f32.mrb[89].mxu1 }
 0x48b   :  { %v3212_v4 = vpop.eup %3211  ;;  %v1755_v2 = vadd.f32 1.0, %v3210_v19 }
 0x48c   :  { %3221 = vpow2.f32 %v1704_v5  ;;  %v1663_v40 = vsub.f32 0.0, %v1549_v25  ;;  %2836 = vmatprep.mubr.msk.f32.mxu0 %vm1813_vm7, %v3212_v4 }
 0x48d   :  { %3223 = vrcp.f32 %v1755_v2  ;;  %v1553_v48 = vpop.f32.mrb[90].mxu1 }
 0x48e   :  { %v3214_v44 = vpop.eup %3213  ;;  %v1706_v36 = vmul.f32 1.442695, %v1663_v40  ;;  %v1554_v52 = vadd.f32 %v1553_v48, %v4581_v21  ;;  %v1555_v54 = vpop.f32.mrb[91].mxu1 }
 0x48f   :  { %v3216_v35 = vpop.eup %3215  ;;  %v1756_v38 = vadd.f32 1.0, %v3214_v44 }
 0x490   :  { %3225 = vpow2.f32 %v1706_v36  ;;  %v1664_v26 = vsub.f32 0.0, %v1554_v52  ;;  %2837 = vmatmul.mubr.msk.f32.gmra.mrb[70].mxu0 %vm1813_vm7, %v3216_v35 }
 0x491   :  { %3227 = vrcp.f32 %v1756_v38  ;;  %v1558_v55 = vpop.f32.mrb[92].mxu1 }
 0x492   :  { %v3218_v53 = vpop.eup %3217  ;;  %v1708_v57 = vmul.f32 1.442695, %v1664_v26  ;;  %v1559_v29 = vadd.f32 %v1558_v55, %v4583_v41  ;;  %v1560_v42 = vpop.f32.mrb[93].mxu1 }
 0x493   :  { %v3220_v27 = vpop.eup %3219  ;;  %v1757_v43 = vadd.f32 1.0, %v3218_v53 }
 0x494   :  { %3229 = vpow2.f32 %v1708_v57  ;;  %v1665_v18 = vsub.f32 0.0, %v1559_v29  ;;  %2839 = vmatprep.mubr.msk.f32.mxu0 %vm1813_vm7, %v3220_v27 }
 0x495   :  { %3231 = vrcp.f32 %v1757_v43  ;;  %v1563_v21 = vpop.f32.mrb[94].mxu1 }
 0x496   :  { %v3222_v50 = vpop.eup %3221  ;;  %v1710_v46 = vmul.f32 1.442695, %v1665_v18  ;;  %v1564_v45 = vadd.f32 %v1563_v21, %v4585_v59  ;;  %v1565_v49 = vpop.f32.mrb[95].mxu1 }
 0x497   :  { %v3224_v3 = vpop.eup %3223  ;;  %v1758_v12 = vadd.f32 1.0, %v3222_v50 }
 0x498   :  { %3233 = vpow2.f32 %v1710_v46  ;;  %v1666_v61 = vsub.f32 0.0, %v1564_v45  ;;  %2840 = vmatmul.mubr.msk.f32.gmra.mrb[72].mxu0 %vm1813_vm7, %v3224_v3 }
 0x499   :  { %3235 = vrcp.f32 %v1758_v12  ;;  %v1568_v41 = vpop.f32.mrb[96].mxu1 }
 0x49a   :  { %v3226_v56 = vpop.eup %3225  ;;  %v1712_v28 = vmul.f32 1.442695, %v1666_v61  ;;  %v1569_v30 = vadd.f32 %v1568_v41, %v4587_v13  ;;  %v1570_v31 = vpop.f32.mrb[97].mxu1 }
 0x49b   :  { %v3228_v60 = vpop.eup %3227  ;;  %v1759_v8 = vadd.f32 1.0, %v3226_v56 }
 0x49c   :  { %3237 = vpow2.f32 %v1712_v28  ;;  %v1667_v17 = vsub.f32 0.0, %v1569_v30  ;;  %2842 = vmatprep.mubr.msk.f32.mxu0 %vm1813_vm7, %v3228_v60 }
 0x49d   :  { %3239 = vrcp.f32 %v1759_v8  ;;  %v1573_v59 = vpop.f32.mrb[34].mxu1 }
 0x49e   :  { %v3230_v6 = vpop.eup %3229  ;;  %v1714_v7 = vmul.f32 1.442695, %v1667_v17  ;;  %v1668_v58 = vsub.f32 0.0, %v1573_v59  ;;  %v1575_v20 = vpop.f32.mrb[35].mxu1 }
 0x49f   :  { %v3232_v1 = vpop.eup %3231  ;;  %v1760_v0 = vadd.f32 1.0, %v3230_v6 }
 0x4a0   :  { %3241 = vpow2.f32 %v1714_v7  ;;  %v1716_v23 = vmul.f32 1.442695, %v1668_v58  ;;  %2843 = vmatmul.mubr.msk.f32.gmra.mrb[74].mxu0 %vm1813_vm7, %v3232_v1 }
 0x4a1   :  { %3243 = vrcp.f32 %v1760_v0  ;;  %v1578_v13 = vpop.f32.mrb[36].mxu1 }
 0x4a2   :  { %v3234_v34 = vpop.eup %3233  ;;  %3245 = vpow2.f32 %v1716_v23  ;;  %v1669_v39 = vsub.f32 0.0, %v1578_v13  ;;  %v1580_v33 = vpop.f32.mrb[37].mxu1 }
 0x4a3   :  { %v3236_v24 = vpop.eup %3235  ;;  %v1761_v63 = vadd.f32 1.0, %v3234_v34 }
 0x4a4   :  { %v1718_v11 = vmul.f32 1.442695, %v1669_v39  ;;  %2845 = vmatprep.mubr.msk.f32.mxu0 %vm1813_vm7, %v3236_v24 }
 0x4a5   :  { %3247 = vrcp.f32 %v1761_v63  ;;  %v1583_v37 = vpop.f32.mrb[38].mxu1 }
 0x4a6   :  { %v3238_v19 = vpop.eup %3237  ;;  %3249 = vpow2.f32 %v1718_v11  ;;  %v1670_v5 = vsub.f32 0.0, %v1583_v37  ;;  %v1585_v25 = vpop.f32.mrb[39].mxu1 }
 0x4a7   :  { %v3240_v47 = vpop.eup %3239  ;;  %v1762_v4 = vadd.f32 1.0, %v3238_v19 }
 0x4a8   :  { %v1720_v2 = vmul.f32 1.442695, %v1670_v5  ;;  %2846 = vmatmul.mubr.msk.f32.gmra.mrb[76].mxu0 %vm1813_vm7, %v3240_v47 }
 0x4a9   :  { %3251 = vrcp.f32 %v1762_v4  ;;  %v1588_v40 = vpop.f32.mrb[40].mxu1 }
 0x4aa   :  { %v3242_v48 = vpop.eup %3241  ;;  %3253 = vpow2.f32 %v1720_v2  ;;  %v1671_v44 = vsub.f32 0.0, %v1588_v40  ;;  %v1590_v36 = vpop.f32.mrb[41].mxu1 }
 0x4ab   :  { %v3244_v52 = vpop.eup %3243  ;;  %v1763_v54 = vadd.f32 1.0, %v3242_v48 }
 0x4ac   :  { %v3246_v35 = vpop.eup %3245  ;;  %v1722_v38 = vmul.f32 1.442695, %v1671_v44  ;;  %2848 = vmatprep.mubr.msk.f32.mxu0 %vm1813_vm7, %v3244_v52 }
 0x4ad   :  { %3255 = vrcp.f32 %v1763_v54  ;;  %v1764_v26 = vadd.f32 1.0, %v3246_v35  ;;  %v1593_v55 = vpop.f32.mrb[42].mxu1 }
 0x4ae   :  { %3257 = vpow2.f32 %v1722_v38  ;;  %v1672_v53 = vsub.f32 0.0, %v1593_v55  ;;  %v1595_v57 = vpop.f32.mrb[43].mxu1 }
 0x4af   :  { %v3248_v29 = vpop.eup %3247  ;;  %3259 = vrcp.f32 %v1764_v26 }
 0x4b0   :  { %v3250_v42 = vpop.eup %3249  ;;  %v1724_v27 = vmul.f32 1.442695, %v1672_v53  ;;  %2849 = vmatmul.mubr.msk.f32.gmra.mrb[78].mxu0 %vm1813_vm7, %v3248_v29 }
 0x4b1   :  { %v1765_v43 = vadd.f32 1.0, %v3250_v42  ;;  %v1598_v18 = vpop.f32.mrb[44].mxu1 }
 0x4b2   :  { %3261 = vpow2.f32 %v1724_v27  ;;  %v1673_v21 = vsub.f32 0.0, %v1598_v18  ;;  %v1600_v50 = vpop.f32.mrb[45].mxu1 }
 0x4b3   :  { %v3252_v46 = vpop.eup %3251  ;;  %3263 = vrcp.f32 %v1765_v43 }
 0x4b4   :  { %v3254_v45 = vpop.eup %3253  ;;  %v1726_v49 = vmul.f32 1.442695, %v1673_v21  ;;  %2851 = vmatprep.mubr.msk.f32.mxu0 %vm1813_vm7, %v3252_v46 }
 0x4b5   :  { %v1766_v3 = vadd.f32 1.0, %v3254_v45  ;;  %v1603_v12 = vpop.f32.mrb[46].mxu1 }
 0x4b6   :  { %3265 = vpow2.f32 %v1726_v49  ;;  %v1674_v61 = vsub.f32 0.0, %v1603_v12  ;;  %v1605_v41 = vpop.f32.mrb[47].mxu1 }
 0x4b7   :  { %v3256_v56 = vpop.eup %3255  ;;  %3267 = vrcp.f32 %v1766_v3 }
 0x4b8   :  { %v3258_v28 = vpop.eup %3257  ;;  %v1728_v30 = vmul.f32 1.442695, %v1674_v61  ;;  %2852 = vmatmul.mubr.msk.f32.gmra.mrb[80].mxu0 %vm1813_vm7, %v3256_v56 }
 0x4b9   :  { %v3260_v31 = vpop.eup %3259  ;;  %v1767_v60 = vadd.f32 1.0, %v3258_v28  ;;  %v1608_v8 = vpop.f32.mrb[48].mxu1 }
 0x4ba   :  { %3269 = vpow2.f32 %v1728_v30  ;;  %v1675_v17 = vsub.f32 0.0, %v1608_v8  ;;  %v1610_v59 = vpop.f32.mrb[49].mxu1  ;;  %2854 = vmatprep.mubr.msk.f32.mxu0 %vm1813_vm7, %v3260_v31 }
 0x4bb   :  { %3271 = vrcp.f32 %v1767_v60 }
 0x4bc   :  { %v3262_v6 = vpop.eup %3261  ;;  %v1730_v7 = vmul.f32 1.442695, %v1675_v17 }
 0x4bd   :  { %v3264_v58 = vpop.eup %3263  ;;  %v1768_v20 = vadd.f32 1.0, %v3262_v6  ;;  %v1613_v1 = vpop.f32.mrb[50].mxu1 }
 0x4be   :  { %3273 = vpow2.f32 %v1730_v7  ;;  %v1676_v0 = vsub.f32 0.0, %v1613_v1  ;;  %v1615_v23 = vpop.f32.mrb[51].mxu1  ;;  %2855 = vmatmul.mubr.msk.f32.gmra.mrb[82].mxu0 %vm1813_vm7, %v3264_v58 }
 0x4bf   :  { %3275 = vrcp.f32 %v1768_v20 }
 0x4c0   :  { %v3266_v13 = vpop.eup %3265  ;;  %v1732_v34 = vmul.f32 1.442695, %v1676_v0 }
 0x4c1   :  { %v3268_v39 = vpop.eup %3267  ;;  %v1769_v33 = vadd.f32 1.0, %v3266_v13  ;;  %v1618_v24 = vpop.f32.mrb[52].mxu1 }
 0x4c2   :  { %3277 = vpow2.f32 %v1732_v34  ;;  %v1677_v63 = vsub.f32 0.0, %v1618_v24  ;;  %v1620_v11 = vpop.f32.mrb[53].mxu1  ;;  %2857 = vmatprep.mubr.msk.f32.mxu0 %vm1813_vm7, %v3268_v39 }
 0x4c3   :  { %3279 = vrcp.f32 %v1769_v33 }
 0x4c4   :  { %v3270_v37 = vpop.eup %3269  ;;  %v1734_v19 = vmul.f32 1.442695, %v1677_v63 }
 0x4c5   :  { %v3272_v5 = vpop.eup %3271  ;;  %v1770_v25 = vadd.f32 1.0, %v3270_v37  ;;  %v1623_v47 = vpop.f32.mrb[54].mxu1 }
 0x4c6   :  { %3281 = vpow2.f32 %v1734_v19  ;;  %v1678_v4 = vsub.f32 0.0, %v1623_v47  ;;  %v1625_v2 = vpop.f32.mrb[55].mxu1  ;;  %2858 = vmatmul.mubr.msk.f32.gmra.mrb[84].mxu0 %vm1813_vm7, %v3272_v5  ;;  %v4634_v47 = vld [vmem:[%s4799_s7] ss:$0 sm:$0xff] }
 0x4c7   :  { %3283 = vrcp.f32 %v1770_v25 }
 0x4c8   :  { %v3274_v40 = vpop.eup %3273  ;;  %v1736_v48 = vmul.f32 1.442695, %v1678_v4 }
 0x4c9   :  { %v3276_v44 = vpop.eup %3275  ;;  %v1771_v36 = vadd.f32 1.0, %v3274_v40  ;;  %v1628_v52 = vpop.f32.mrb[56].mxu1  ;;  %v2243_v40 = vld [vmem:[%s4800_s8 + $0x8] sm:$0xff] }
 0x4ca   :  { %3285 = vpow2.f32 %v1736_v48  ;;  %v1679_v54 = vsub.f32 0.0, %v1628_v52  ;;  %v1630_v35 = vpop.f32.mrb[57].mxu1  ;;  %2860 = vmatprep.mubr.msk.f32.mxu0 %vm1813_vm7, %v3276_v44 }
 0x4cb   :  { %3287 = vrcp.f32 %v1771_v36 }
 0x4cc   :  { %v3278_v38 = vpop.eup %3277  ;;  %v1738_v26 = vmul.f32 1.442695, %v1679_v54 }
 0x4cd   :  { %v3280_v55 = vpop.eup %3279  ;;  %v1772_v53 = vadd.f32 1.0, %v3278_v38  ;;  %v1633_v57 = vpop.f32.mrb[58].mxu1 }
 0x4ce   :  { %3289 = vpow2.f32 %v1738_v26  ;;  %v1680_v29 = vsub.f32 0.0, %v1633_v57  ;;  %v1635_v42 = vpop.f32.mrb[59].mxu1  ;;  %2861 = vmatmul.mubr.msk.f32.gmra.mrb[86].mxu0 %vm1813_vm7, %v3280_v55 }
 0x4cf   :  { %3291 = vrcp.f32 %v1772_v53 }
 0x4d0   :  { %v3282_v27 = vpop.eup %3281  ;;  %v1740_v43 = vmul.f32 1.442695, %v1680_v29 }
 0x4d1   :  { %v3284_v18 = vpop.eup %3283  ;;  %v1773_v21 = vadd.f32 1.0, %v3282_v27  ;;  %v1638_v50 = vpop.f32.mrb[60].mxu1 }
 0x4d2   :  { %3293 = vpow2.f32 %v1740_v43  ;;  %v1681_v46 = vsub.f32 0.0, %v1638_v50  ;;  %v1640_v45 = vpop.f32.mrb[61].mxu1  ;;  %2863 = vmatprep.mubr.msk.f32.mxu0 %vm1813_vm7, %v3284_v18 }
 0x4d3   :  { %3295 = vrcp.f32 %v1773_v21 }
 0x4d4   :  { %v3286_v49 = vpop.eup %3285  ;;  %v1742_v3 = vmul.f32 1.442695, %v1681_v46 }
 0x4d5   :  { %v3288_v12 = vpop.eup %3287  ;;  %v1774_v61 = vadd.f32 1.0, %v3286_v49  ;;  %v1643_v41 = vpop.f32.mrb[62].mxu1 }
 0x4d6   :  { %3297 = vpow2.f32 %v1742_v3  ;;  %v1682_v56 = vsub.f32 0.0, %v1643_v41  ;;  %v1645_v28 = vpop.f32.mrb[63].mxu1  ;;  %2864 = vmatmul.mubr.msk.f32.gmra.mrb[88].mxu0 %vm1813_vm7, %v3288_v12 }
 0x4d7   :  { %3299 = vrcp.f32 %v1774_v61 }
 0x4d8   :  { %v3290_v30 = vpop.eup %3289  ;;  %v1744_v31 = vmul.f32 1.442695, %v1682_v56 }
 0x4d9   :  { %v3292_v60 = vpop.eup %3291  ;;  %v1775_v8 = vadd.f32 1.0, %v3290_v30  ;;  %v1648_v17 = vpop.f32.mrb[64].mxu1 }
 0x4da   :  { %3301 = vpow2.f32 %v1744_v31  ;;  %v1683_v59 = vsub.f32 0.0, %v1648_v17  ;;  %v1650_v6 = vpop.f32.mrb[65].mxu1  ;;  %2866 = vmatprep.mubr.msk.f32.mxu0 %vm1813_vm7, %v3292_v60 }
 0x4db   :  { %3303 = vrcp.f32 %v1775_v8  ;;  %v4830_v8 = vld [vmem:[#allocation8_spill] sm:$0xff] }
 0x4dc   :  { %v3294_v7 = vpop.eup %3293  ;;  %v1746_v58 = vmul.f32 1.442695, %v1683_v59 }
 0x4dd   :  { %v3296_v20 = vpop.eup %3295  ;;  %v1776_v1 = vadd.f32 1.0, %v3294_v7 }
 0x4de   :  { %3305 = vpow2.f32 %v1746_v58  ;;  %2867 = vmatmul.mubr.msk.f32.gmra.mrb[90].mxu0 %vm1813_vm7, %v3296_v20  ;;  %v4831_v20 = vld [vmem:[#allocation9_spill] sm:$0xff] }
 0x4df   :  { %3307 = vrcp.f32 %v1776_v1 }
 0x4e0   :  { %v3298_v0 = vpop.eup %3297 }
 0x4e1   :  { %v3300_v23 = vpop.eup %3299  ;;  %v1777_v13 = vadd.f32 1.0, %v3298_v0 }
 0x4e2   :  { %2869 = vmatprep.mubr.msk.f32.mxu0 %vm1813_vm7, %v3300_v23  ;;  %v4832_v23 = vld [vmem:[#allocation10_spill] sm:$0xff] }
 0x4e3   :  { %3309 = vrcp.f32 %v1777_v13 }
 0x4e4   :  { %v3302_v34 = vpop.eup %3301 }
 0x4e5   :  { %v3304_v39 = vpop.eup %3303  ;;  %v1778_v33 = vadd.f32 1.0, %v3302_v34 }
 0x4e6   :  { %2870 = vmatmul.mubr.msk.f32.gmra.mrb[92].mxu0 %vm1813_vm7, %v3304_v39 }
 0x4e7   :  { %3311 = vrcp.f32 %v1778_v33 }
 0x4e8   :  { %v3306_v24 = vpop.eup %3305 }
 0x4e9   :  { %v3308_v63 = vpop.eup %3307  ;;  %v1779_v11 = vadd.f32 1.0, %v3306_v24 }
 0x4ea   :  { %2872 = vmatprep.mubr.msk.f32.mxu0 %vm1813_vm7, %v3308_v63 }
 0x4eb   :  { %3313 = vrcp.f32 %v1779_v11  ;;  %v4833_v11 = vld [vmem:[#allocation11_spill] sm:$0xff] }
 0x4ed   :  { %v3310_v37 = vpop.eup %3309 }
 0x4ee   :  { %2873 = vmatmul.mubr.msk.f32.gmra.mrb[94].mxu0 %vm1813_vm7, %v3310_v37 }
 0x4f1   :  { %v3312_v19 = vpop.eup %3311 }
 0x4f2   :  { %2875 = vmatprep.mubr.msk.f32.mxu0 %vm1813_vm7, %v3312_v19 }
 0x4f5   :  { %v3314_v5 = vpop.eup %3313 }
 0x4f6   :  { %2876 = vmatmul.mubr.msk.f32.gmra.mrb[96].mxu0 %vm1813_vm7, %v3314_v5  ;;  %v4834_v5 = vld [vmem:[#allocation12_spill] sm:$0xff] }
 0x4f7   :  { %2322 = vmatprep.mubr.f32.mxu0 %v2243_v40 }
 0x553   :  { %v2832_v25 = vpop.f32.mrb[66].mxu0 }
 0x554   :  { %v2140_v4 = vmul.f32 %v2832_v25, %v4314_v62  ;;  %v1980_v2 = vpop.f32.mrb[67].mxu0 }
 0x555   :  { %v2139_v48 = vmul.f32 %v1980_v2, %v4316_v10 }
 0x556   :  { %v2179_v44 = vadd.f32 %v4634_v47, %v2140_v4 }
 0x557   :  { %v2178_v36 = vadd.f32 %v4634_v47, %v2139_v48 }
 0x558   :  { %v2211_v52 = vmax.f32 %v2179_v44, 0.0 }
 0x559   :  { %v2210_v54 = vmax.f32 %v2178_v36, 0.0 }
 0x55b   :  { %v4643_v35 = vpack.c.bf16 %v2211_v52, %v2210_v54  ;;  %v2835_v38 = vpop.f32.mrb[68].mxu0  ;;  %v4835_v52 = vld [vmem:[#allocation13_spill] sm:$0xff] }
 0x55c   :  { %v2142_v26 = vmul.f32 %v2835_v38, %v4322_v15  ;;  %v1990_v62 = vpop.f32.mrb[69].mxu0 }
 0x55d   :  { %v2141_v55 = vmul.f32 %v1990_v62, %v4324_v22 }
 0x55e   :  { %v2181_v53 = vadd.f32 %v4634_v47, %v2142_v26  ;;  %v4836_v26 = vld [vmem:[#allocation14_spill] sm:$0xff] }
 0x55f   :  { %v2180_v57 = vadd.f32 %v4634_v47, %v2141_v55 }
 0x560   :  { %v2213_v10 = vmax.f32 %v2181_v53, 0.0 }
 0x561   :  { %v2212_v29 = vmax.f32 %v2180_v57, 0.0 }
 0x563   :  { %v4649_v42 = vpack.c.bf16 %v2213_v10, %v2212_v29  ;;  %v2838_v27 = vpop.f32.mrb[70].mxu0 }
 0x564   :  { %v2144_v43 = vmul.f32 %v2838_v27, %v4328_v32  ;;  %v2000_v18 = vpop.f32.mrb[71].mxu0  ;;  %v4837_v27 = vld [vmem:[#allocation15_spill] sm:$0xff] }
 0x565   :  { %v2143_v21 = vmul.f32 %v2000_v18, %v4330_v51 }
 0x566   :  { %v2183_v50 = vadd.f32 %v4634_v47, %v2144_v43 }
 0x567   :  { %v2182_v15 = vadd.f32 %v4634_v47, %v2143_v21 }
 0x568   :  { %v2215_v46 = vmax.f32 %v2183_v50, 0.0  ;;  %v4838_v50 = vld [vmem:[#allocation16_spill] sm:$0xff] }
 0x569   :  { %v2214_v22 = vmax.f32 %v2182_v15, 0.0 }
 0x56b   :  { %v4655_v45 = vpack.c.bf16 %v2215_v46, %v2214_v22  ;;  %v2841_v49 = vpop.f32.mrb[72].mxu0 }
 0x56c   :  { %v2146_v3 = vmul.f32 %v2841_v49, %v4338_v9  ;;  %v2010_v12 = vpop.f32.mrb[73].mxu0 }
 0x56d   :  { %v2145_v61 = vmul.f32 %v2010_v12, %v4340_v14 }
 0x56e   :  { %v2185_v41 = vadd.f32 %v4634_v47, %v2146_v3 }
 0x56f   :  { %v2184_v32 = vadd.f32 %v4634_v47, %v2145_v61 }
 0x570   :  { %v2217_v56 = vmax.f32 %v2185_v41, 0.0  ;;  %v4839_v41 = vld [vmem:[#allocation17_spill] sm:$0xff] }
 0x571   :  { %v2216_v51 = vmax.f32 %v2184_v32, 0.0 }
 0x573   :  { %v4661_v28 = vpack.c.bf16 %v2217_v56, %v2216_v51  ;;  %v2844_v30 = vpop.f32.mrb[74].mxu0  ;;  %v4840_v51 = vld [vmem:[#allocation18_spill] sm:$0xff] }
 0x574   :  { %v2148_v31 = vmul.f32 %v2844_v30, %v4344_v16  ;;  %v2020_v60 = vpop.f32.mrb[75].mxu0 }
 0x575   :  { %v2147_v17 = vmul.f32 %v2020_v60, %v4830_v8 }
 0x576   :  { %v2187_v59 = vadd.f32 %v4634_v47, %v2148_v31 }
 0x577   :  { %v2186_v9 = vadd.f32 %v4634_v47, %v2147_v17 }
 0x578   :  { %v2219_v6 = vmax.f32 %v2187_v59, 0.0 }
 0x579   :  { %v2218_v14 = vmax.f32 %v2186_v9, 0.0 }
 0x57b   :  { %v4667_v7 = vpack.c.bf16 %v2219_v6, %v2218_v14  ;;  %v2847_v58 = vpop.f32.mrb[76].mxu0  ;;  %v4841_v6 = vld [vmem:[#allocation19_spill] sm:$0xff] }
 0x57c   :  { %v2150_v1 = vmul.f32 %v2847_v58, %v4831_v20  ;;  %v2030_v0 = vpop.f32.mrb[77].mxu0  ;;  %v4842_v20 = vld [vmem:[#allocation20_spill] sm:$0xff] }
 0x57d   :  { %v2149_v13 = vmul.f32 %v2030_v0, %v4832_v23 }
 0x57e   :  { %v2189_v34 = vadd.f32 %v4634_v47, %v2150_v1 }
 0x57f   :  { %v2188_v16 = vadd.f32 %v4634_v47, %v2149_v13 }
 0x580   :  { %v2221_v39 = vmax.f32 %v2189_v34, 0.0 }
 0x581   :  { %v2220_v33 = vmax.f32 %v2188_v16, 0.0 }
 0x583   :  { %v4673_v24 = vpack.c.bf16 %v2221_v39, %v2220_v33  ;;  %v2850_v63 = vpop.f32.mrb[78].mxu0  ;;  %v4843_v39 = vld [vmem:[#allocation21_spill] sm:$0xff] }
 0x584   :  { %v2152_v37 = vmul.f32 %v2850_v63, %v4833_v11  ;;  %v2040_v19 = vpop.f32.mrb[79].mxu0  ;;  %v4844_v11 = vld [vmem:[#allocation22_spill] sm:$0xff] }
 0x585   :  { %v2151_v25 = vmul.f32 %v2040_v19, %v4834_v5 }
 0x586   :  { %v2191_v4 = vadd.f32 %v4634_v47, %v2152_v37 }
 0x587   :  { %v2190_v2 = vadd.f32 %v4634_v47, %v2151_v25 }
 0x588   :  { %v2223_v40 = vmax.f32 %v2191_v4, 0.0 }
 0x589   :  { %v2222_v48 = vmax.f32 %v2190_v2, 0.0 }
 0x58b   :  { %v4679_v44 = vpack.c.bf16 %v2223_v40, %v2222_v48  ;;  %v2853_v36 = vpop.f32.mrb[80].mxu0  ;;  %v4845_v40 = vld [vmem:[#allocation23_spill] sm:$0xff] }
 0x58c   :  { %v2154_v54 = vmul.f32 %v2853_v36, %v4835_v52  ;;  %v2050_v38 = vpop.f32.mrb[81].mxu0  ;;  %v4846_v52 = vld [vmem:[#allocation24_spill] sm:$0xff] }
 0x58d   :  { %v2153_v62 = vmul.f32 %v2050_v38, %v4836_v26 }
 0x58e   :  { %v2193_v55 = vadd.f32 %v4634_v47, %v2154_v54 }
 0x58f   :  { %v2192_v53 = vadd.f32 %v4634_v47, %v2153_v62 }
 0x590   :  { %v2225_v57 = vmax.f32 %v2193_v55, 0.0 }
 0x591   :  { %v2224_v10 = vmax.f32 %v2192_v53, 0.0  ;;  %v2856_v29 = vpop.f32.mrb[82].mxu0 }
 0x592   :  { %v2156_v43 = vmul.f32 %v2856_v29, %v4837_v27  ;;  %v2060_v18 = vpop.f32.mrb[83].mxu0  ;;  %v4848_v27 = vld [vmem:[#allocation26_spill] sm:$0xff] }
 0x593   :  { %v4686_v21 = vpack.c.bf16 %v2225_v57, %v2224_v10  ;;  %v2155_v15 = vmul.f32 %v2060_v18, %v4838_v50  ;;  %v4847_v57 = vld [vmem:[#allocation25_spill] sm:$0xff] }
 0x594   :  { %v2195_v46 = vadd.f32 %v4634_v47, %v2156_v43 }
 0x595   :  { %v2194_v22 = vadd.f32 %v4634_v47, %v2155_v15 }
 0x596   :  { %v2227_v49 = vmax.f32 %v2195_v46, 0.0 }
 0x597   :  { %v2226_v3 = vmax.f32 %v2194_v22, 0.0 }
 0x599   :  { %v2859_v12 = vpop.f32.mrb[84].mxu0  ;;  %v3062_v61 = vpack.c.bf16 %v2227_v49, %v2226_v3  ;;  %v4849_v49 = vld [vmem:[#allocation27_spill] sm:$0xff] }
 0x59a   :  { %v2158_v32 = vmul.f32 %v2859_v12, %v4839_v41  ;;  %v2070_v56 = vpop.f32.mrb[85].mxu0 }
 0x59b   :  { %v2157_v30 = vmul.f32 %v2070_v56, %v4840_v51  ;;  %3063 = vmatprep.subr.bf16.mxu0 %v3062_v61  ;;  %v4850_v61 = vld [vmem:[#allocation28_spill] sm:$0xff] }
 0x59c   :  { %v2197_v31 = vadd.f32 %v4634_v47, %v2158_v32  ;;  %3065 = vmatpush3.bf16.msra.mxu0 %v4643_v35 }
 0x59d   :  { %v2196_v60 = vadd.f32 %v4634_v47, %v2157_v30 }
 0x59e   :  { %v2229_v8 = vmax.f32 %v2197_v31, 0.0 }
 0x59f   :  { %v2228_v17 = vmax.f32 %v2196_v60, 0.0  ;;  %v4851_v60 = vld [vmem:[#allocation29_spill] sm:$0xff] }
 0x5a1   :  { %v2862_v59 = vpop.f32.mrb[86].mxu0  ;;  %v3066_v9 = vpack.c.bf16 %v2229_v8, %v2228_v17 }
 0x5a2   :  { %v2160_v14 = vmul.f32 %v2862_v59, %v4841_v6  ;;  %v2080_v58 = vpop.f32.mrb[87].mxu0  ;;  %v4852_v59 = vld [vmem:[#allocation30_spill] sm:$0xff] }
 0x5a3   :  { %v2159_v1 = vmul.f32 %v2080_v58, %v4842_v20  ;;  %3067 = vmatprep.subr.bf16.mxu0 %v3066_v9 }
 0x5a4   :  { %v2199_v0 = vadd.f32 %v4634_v47, %v2160_v14  ;;  %3069 = vmatpush3.bf16.msra.mxu0 %v4649_v42 }
 0x5a5   :  { %v2198_v23 = vadd.f32 %v4634_v47, %v2159_v1  ;;  %v2242_v1 = vld [vmem:[%s4800_s8] sm:$0xff] }
 0x5a6   :  { %v2231_v13 = vmax.f32 %v2199_v0, 0.0  ;;  %v2245_v0 = vld [vmem:[%s4800_s8 + $0x18] sm:$0xff] }
 0x5a7   :  { %v2230_v35 = vmax.f32 %v2198_v23, 0.0  ;;  %v2249_v23 = vld [vmem:[%s4800_s8 + $0x38] sm:$0xff] }
 0x5a9   :  { %v2865_v34 = vpop.f32.mrb[88].mxu0  ;;  %v3070_v16 = vpack.c.bf16 %v2231_v13, %v2230_v35  ;;  %v2248_v13 = vld [vmem:[%s4800_s8 + $0x30] sm:$0xff]  ;;  %v2251_v35 = vld [vmem:[%s4800_s8 + $0x48] sm:$0xff] }
 0x5aa   :  { %v2162_v33 = vmul.f32 %v2865_v34, %v4843_v39  ;;  %v2090_v63 = vpop.f32.mrb[89].mxu0  ;;  %v2250_v34 = vld [vmem:[%s4800_s8 + $0x40] sm:$0xff]  ;;  %v2252_v39 = vld [vmem:[%s4800_s8 + $0x50] sm:$0xff] }
 0x5ab   :  { %v2161_v37 = vmul.f32 %v2090_v63, %v4844_v11  ;;  %3071 = vmatprep.subr.bf16.mxu0 %v3070_v16  ;;  %v2253_v16 = vld [vmem:[%s4800_s8 + $0x58] sm:$0xff]  ;;  %v2254_v63 = vld [vmem:[%s4800_s8 + $0x60] sm:$0xff] }
 0x5ac   :  { %v2201_v19 = vadd.f32 %v4634_v47, %v2162_v33  ;;  %3073 = vmatpush3.bf16.msra.mxu0 %v4655_v45  ;;  %v2255_v33 = vld [vmem:[%s4800_s8 + $0x68] sm:$0xff]  ;;  %v2257_v11 = vld [vmem:[%s4800_s8 + $0x78] sm:$0xff] }
 0x5ad   :  { %v2200_v5 = vadd.f32 %v4634_v47, %v2161_v37  ;;  %v2256_v37 = vld [vmem:[%s4800_s8 + $0x70] sm:$0xff] }
 0x5ae   :  { %v2233_v25 = vmax.f32 %v2201_v19, 0.0 }
 0x5af   :  { %v2232_v42 = vmax.f32 %v2200_v5, 0.0 }
 0x5b1   :  { %v2868_v4 = vpop.f32.mrb[90].mxu0  ;;  %v3074_v2 = vpack.c.bf16 %v2233_v25, %v2232_v42 }
 0x5b2   :  { %v2164_v48 = vmul.f32 %v2868_v4, %v4845_v40  ;;  %v2100_v36 = vpop.f32.mrb[91].mxu0 }
 0x5b3   :  { %v2163_v54 = vmul.f32 %v2100_v36, %v4846_v52  ;;  %3075 = vmatprep.subr.bf16.mxu0 %v3074_v2 }
 0x5b4   :  { %v2203_v38 = vadd.f32 %v4634_v47, %v2164_v48  ;;  %3077 = vmatpush3.bf16.msra.mxu0 %v4661_v28 }
 0x5b5   :  { %v2202_v26 = vadd.f32 %v4634_v47, %v2163_v54 }
 0x5b6   :  { %v2235_v62 = vmax.f32 %v2203_v38, 0.0 }
 0x5b7   :  { %v2234_v45 = vmax.f32 %v2202_v26, 0.0 }
 0x5b9   :  { %v2871_v55 = vpop.f32.mrb[92].mxu0  ;;  %v3078_v53 = vpack.c.bf16 %v2235_v62, %v2234_v45 }
 0x5ba   :  { %v2166_v10 = vmul.f32 %v2871_v55, %v4847_v57  ;;  %v2110_v29 = vpop.f32.mrb[93].mxu0 }
 0x5bb   :  { %v2165_v43 = vmul.f32 %v2110_v29, %v4848_v27  ;;  %3079 = vmatprep.subr.bf16.mxu0 %v3078_v53 }
 0x5bc   :  { %v2205_v18 = vadd.f32 %v4634_v47, %v2166_v10  ;;  %3081 = vmatpush3.bf16.msra.mxu0 %v4667_v7 }
 0x5bd   :  { %v2204_v50 = vadd.f32 %v4634_v47, %v2165_v43 }
 0x5be   :  { %v2237_v15 = vmax.f32 %v2205_v18, 0.0 }
 0x5bf   :  { %v2236_v28 = vmax.f32 %v2204_v50, 0.0 }
 0x5c1   :  { %v2874_v46 = vpop.f32.mrb[94].mxu0  ;;  %v3082_v22 = vpack.c.bf16 %v2237_v15, %v2236_v28 }
 0x5c2   :  { %v2168_v3 = vmul.f32 %v2874_v46, %v4849_v49  ;;  %v2120_v12 = vpop.f32.mrb[95].mxu0 }
 0x5c3   :  { %v2167_v41 = vmul.f32 %v2120_v12, %v4850_v61  ;;  %3083 = vmatprep.subr.bf16.mxu0 %v3082_v22 }
 0x5c4   :  { %v2207_v32 = vadd.f32 %v4634_v47, %v2168_v3  ;;  %3085 = vmatpush3.bf16.msra.mxu0 %v4673_v24 }
 0x5c5   :  { %v2206_v56 = vadd.f32 %v4634_v47, %v2167_v41 }
 0x5c6   :  { %v2239_v51 = vmax.f32 %v2207_v32, 0.0 }
 0x5c7   :  { %v2238_v7 = vmax.f32 %v2206_v56, 0.0 }
 0x5c9   :  { %v2877_v30 = vpop.f32.mrb[96].mxu0  ;;  %v3086_v31 = vpack.c.bf16 %v2239_v51, %v2238_v7 }
 0x5ca   :  { %v2170_v8 = vmul.f32 %v2877_v30, %v4851_v60  ;;  %v2130_v17 = vpop.f32.mrb[97].mxu0 }
 0x5cb   :  { %v2169_v9 = vmul.f32 %v2130_v17, %v4852_v59  ;;  %3087 = vmatprep.subr.bf16.mxu0 %v3086_v31 }
 0x5cc   :  { %v2209_v6 = vadd.f32 %v4634_v47, %v2170_v8  ;;  %3089 = vmatpush3.bf16.msra.mxu0 %v4679_v44  ;;  %v2247_v44 = vld [vmem:[%s4800_s8 + $0x28] sm:$0xff] }
 0x5cd   :  { %v2208_v14 = vadd.f32 %v4634_v47, %v2169_v9  ;;  %v2244_v47 = vld [vmem:[%s4800_s8 + $0x10] sm:$0xff] }
 0x5ce   :  { %v2241_v58 = vmax.f32 %v2209_v6, 0.0 }
 0x5cf   :  { %v2240_v24 = vmax.f32 %v2208_v14, 0.0 }
 0x5d1   :  { %v3090_v20 = vpack.c.bf16 %v2241_v58, %v2240_v24 }
 0x5d3   :  { %3091 = vmatprep.subr.bf16.mxu0 %v3090_v20 }
 0x5d4   :  { %3093 = vmatpush3.bf16.msra.mxu0 %v4686_v21  ;;  %v2246_v21 = vld [vmem:[%s4800_s8 + $0x20] sm:$0xff]  ;;  %s3369_s8 = smov [#allocation5]  }
 0x5d5   :  { %s2377_s23 = sshll.u32 %s3369_s8, 4  ;;  %s2378_s23 = int_to_ptr.vmem [resolvable:$true] %s2377_s23 }
 0x5d6   :  { %s3337_s24 = scalar_lea.vmem %s2378_s23, 1024  ;;  %p3342_p9 = scmp.lt.s32.totalorder %s2378_s23, %s2378_s23 }
 0x5d7   :  { %2323 = vmatmul.mubr.f32.vlgmr.msra.gmra.mrb[98].mxu0 %v2242_v1  ;;  %p3338_p8 = scmp.ne.s32.totalorder %s2378_s23, %s3337_s24  ;;  %p3343_p10 = scmp.lt.s32.totalorder %s3337_s24, %s3337_s24 }
 0x5d8   :  { %2327 = vmatprep.mubr.f32.mxu0 %v2245_v0 }
 0x5d9   :  { %p3344_p11 = por %p3343_p10, %p3342_p9 }
 0x5db   :  { %2328 = vmatmul.mubr.f32.gmra.mrb[100].mxu0 %v2244_v47  ;;  %p3345_p12 = pnand %p3344_p11, %p3338_p8 }
 0x5dc   :  { %2332 = vmatprep.mubr.f32.mxu0 %v2247_v44 }
 0x5df   :  { %2333 = vmatmul.mubr.f32.gmra.mrb[102].mxu0 %v2246_v21 }
 0x5e0   :  { %2337 = vmatprep.mubr.f32.mxu0 %v2249_v23 }
 0x5e3   :  { %2338 = vmatmul.mubr.f32.gmra.mrb[104].mxu0 %v2248_v13 }
 0x5e4   :  { %2342 = vmatprep.mubr.f32.mxu0 %v2251_v35 }
 0x5e7   :  { %2343 = vmatmul.mubr.f32.gmra.mrb[106].mxu0 %v2250_v34 }
 0x5e8   :  { %2347 = vmatprep.mubr.f32.mxu0 %v2253_v16 }
 0x5eb   :  { %2348 = vmatmul.mubr.f32.gmra.mrb[108].mxu0 %v2252_v39 }
 0x5ec   :  { %2352 = vmatprep.mubr.f32.mxu0 %v2255_v33 }
 0x5ef   :  { %2353 = vmatmul.mubr.f32.gmra.mrb[110].mxu0 %v2254_v63 }
 0x5f0   :  { %2357 = vmatprep.mubr.f32.mxu0 %v2257_v11 }
 0x5f3   :  { %2358 = vmatmul.mubr.f32.gmra.mrb[112].mxu0 %v2256_v37 }
 0x6aa   :  { %v2604_v19 = vpop.f32.mrb[98].mxu0 }
 0x6ab   :  { %v2605_v5 = vpop.f32.mrb[99].mxu0 }
 0x6ac   :  { %v2606_v25 = vadd.f32 %v2605_v5, %v2604_v19 }
 0x6ae   :  { %2364 = vst.msk [vmem:[#allocation5] sm:$0xff] %vm2363_vm8, %v2606_v25  ;;  %v2607_v42 = vpop.f32.mrb[100].mxu0 }
 0x6af   :  { %v2608_v4 = vpop.f32.mrb[101].mxu0 }
 0x6b0   :  { %v2609_v2 = vadd.f32 %v2608_v4, %v2607_v42 }
 0x6b2   :  { %2365 = vst.msk [vmem:[#allocation5 + $0x8] sm:$0xff] %vm2363_vm8, %v2609_v2  ;;  %v2610_v40 = vpop.f32.mrb[102].mxu0 }
 0x6b3   :  { %v2611_v48 = vpop.f32.mrb[103].mxu0 }
 0x6b4   :  { %v2612_v36 = vadd.f32 %v2611_v48, %v2610_v40 }
 0x6b6   :  { %2366 = vst.msk [vmem:[#allocation5 + $0x10] sm:$0xff] %vm2363_vm8, %v2612_v36  ;;  %v2613_v52 = vpop.f32.mrb[104].mxu0 }
 0x6b7   :  { %v2614_v54 = vpop.f32.mrb[105].mxu0 }
 0x6b8   :  { %v2615_v38 = vadd.f32 %v2614_v54, %v2613_v52 }
 0x6ba   :  { %2367 = vst.msk [vmem:[#allocation5 + $0x18] sm:$0xff] %vm2363_vm8, %v2615_v38  ;;  %v2616_v26 = vpop.f32.mrb[106].mxu0 }
 0x6bb   :  { %v2617_v62 = vpop.f32.mrb[107].mxu0 }
 0x6bc   :  { %v2618_v45 = vadd.f32 %v2617_v62, %v2616_v26 }
 0x6be   :  { %2368 = vst.msk [vmem:[#allocation5 + $0x20] sm:$0xff] %vm2363_vm8, %v2618_v45  ;;  %v2619_v55 = vpop.f32.mrb[108].mxu0 }
 0x6bf   :  { %v2620_v53 = vpop.f32.mrb[109].mxu0 }
 0x6c0   :  { %v2621_v57 = vadd.f32 %v2620_v53, %v2619_v55 }
 0x6c2   :  { %2369 = vst.msk [vmem:[#allocation5 + $0x28] sm:$0xff] %vm2363_vm8, %v2621_v57  ;;  %v2622_v10 = vpop.f32.mrb[110].mxu0 }
 0x6c3   :  { %v2623_v29 = vpop.f32.mrb[111].mxu0 }
 0x6c4   :  { %v2624_v27 = vadd.f32 %v2623_v29, %v2622_v10 }
 0x6c6   :  { %2370 = vst.msk [vmem:[#allocation5 + $0x30] sm:$0xff] %vm2363_vm8, %v2624_v27  ;;  %v2625_v43 = vpop.f32.mrb[112].mxu0 }
 0x6c7   :  { %v2626_v18 = vpop.f32.mrb[113].mxu0 }
 0x6c8   :  { %v2627_v50 = vadd.f32 %v2626_v18, %v2625_v43 }
 0x6ca   :  { %2371 = vst.msk [vmem:[#allocation5 + $0x38] sm:$0xff] %vm2363_vm8, %v2627_v50 }
 0x6cb   :  { %3348 = shalt.err (!%p3345_p12)
}
 0x6cc   :  { %s3349_s27 = scalar_lea.hbm %s4801_s9, 1024 }
 0x6cd   :  { %p3350_p13 = scmp.ne.s32.totalorder %s4801_s9, %s3349_s27  ;;  %p3353_p0 = scmp.lt.u32.totalorder %s3349_s27, %s4801_s9 }
 0x6cf   :  { %p3355_p1 = pnand %p3353_p0, %p3350_p13 }
 0x6d1   :  { %3358 = shalt.err (!%p3355_p1)
}
 0x6d2   :  { %s3370_s30 = smov 128   ;;  %s3371_s10 = smov 8  }
 0x6d3   :  { %2383 = dma.vmem_to_hbm [thread:$0]  %s2378_s23, 1024, %s4801_s9, [#allocation4], %s3370_s30, %s3370_s30, %s3371_s10  }
 0x6d4   :  { %3361 = dma.done.wait [#allocation4], 1024  }
 0x6d5   :  { %3362 = vsyncadd [#allocation4], 4294966272 }
 0x6d6   :  { %2387 = vsyncpa [#allocation3], 1 }
 0x6d7   :  { %2388 = vsyncpa [#allocation4], 1 }

</bundles_post_ra>
